<compile_context>
chip_gen: v7x
topology: tpu7x:2x2x1
jax: 0.10.0
libtpu: 0.0.40
codegen_flags: <defaults>
</compile_context>

<pallas_src>
import functools

import jax
import jax.numpy as jnp
from jax import lax
from jax.experimental import pallas as pl
from jax.experimental.pallas import tpu as pltpu

# ---------------- config (small, lane-aligned synthetic shapes) ----------------
B, C, H, W = 2, 4, 32, 32
P = 2                                   # patch size
NV = (H // P) * (W // P)                # 256 visual tokens per image
PDIM = C * P * P                        # 16
E_VIT = 128                             # stand-in ViT embed dim
NT = 16                                 # text tokens per sample
H_TXT = 128                             # stand-in text-encoder hidden size
D = 128                                 # shared embedding dim (projection out)
SPARSITY_THRESH = 0.3
SPARSITY_WEIGHT = 0.1
DROPOUT_P = 0.1


# ---------------- fused Pallas kernel ----------------
def _fused_forward_kernel(text_ref, mask_ref, wt_ref, bt_ref,
                          patches_ref, wp_ref, bp_ref, wv_ref, bv_ref, drop_ref,
                          token_ref, clip_ref, total_ref, con_ref, reg_ref,
                          vis_scr, txt_scr, nonneg_acc, sparse_acc,
                          *, batch, nt, nv, d):
    """Grid step (ti, vj): sims tile for text sample ti vs. visual sample vj."""
    ti = pl.program_id(0)
    vj = pl.program_id(1)
    n_ti = pl.num_programs(0)
    n_vj = pl.num_programs(1)
    f32 = jnp.float32
    bf16 = jnp.bfloat16

    # ---- first grid step: project ALL visual tokens once, zero accumulators ----
    @pl.when(jnp.logical_and(ti == 0, vj == 0))
    def _init():
        # TODO(synk): pretrained DINOv2 backbone (get_intermediate_layers) has no
        # Pallas equivalent; a linear patch embedding stands in for it.
        h = jnp.dot(patches_ref[...].astype(bf16), wp_ref[...].astype(bf16),
                    preferred_element_type=f32) + bp_ref[...]
        vis = jnp.dot(h.astype(bf16), wv_ref[...].astype(bf16),
                      preferred_element_type=f32) + bv_ref[...]
        # Inverted dropout (training mode). NOTE: in production generate the mask
        # in-kernel with pltpu.prng_*; kept as an input so the pure-JAX reference
        # can reproduce it exactly.
        vis = vis * drop_ref[...]
        vis_scr[...] = vis.astype(bf16).reshape(batch, nv, d)
        clip_ref[...] = jnp.zeros_like(clip_ref)
        total_ref[...] = jnp.zeros_like(total_ref)
        con_ref[...] = jnp.zeros_like(con_ref)
        reg_ref[...] = jnp.zeros_like(reg_ref)
        nonneg_acc[...] = jnp.zeros_like(nonneg_acc)
        sparse_acc[...] = jnp.zeros_like(sparse_acc)

    # ---- project this text sample once per text-row tile (vj is inner axis) ----
    @pl.when(vj == 0)
    def _project_text():
        t = jnp.dot(text_ref[...].astype(bf16), wt_ref[...].astype(bf16),
                    preferred_element_type=f32) + bt_ref[...]
        txt_scr[...] = t.astype(bf16)

    # ---- token similarities for this (text sample, visual sample) tile ----
    sims = lax.dot_general(txt_scr[...], vis_scr[vj],
                           (((1,), (1,)), ((), ())),
                           preferred_element_type=f32)             # (NT, NV) f32
    token_ref[...] = sims.astype(token_ref.dtype)                  # bf16 slab tile

    m = mask_ref[...]                                              # (NT, 1) f32

    # ---- clip_sims[ti, vj]: max over patches, masked mean over text tokens ----
    max_sims = jnp.max(sims, axis=-1, keepdims=True)               # (NT, 1)
    num = jnp.sum(max_sims * m, keepdims=True)                     # (1, 1)
    den = jnp.maximum(jnp.sum(m, keepdims=True), 1e-7)             # (1, 1)
    row_sel = (lax.broadcasted_iota(jnp.int32, (batch, 1), 0) == ti).astype(f32)
    col_sel = (lax.broadcasted_iota(jnp.int32, (1, batch), 1) == vj).astype(f32)
    clip_ref[...] += (row_sel * col_sel) * (num / den)

    # ---- reg 1: negative-similarity penalty (per-tile partial sum) ----
    neg = jnp.clip(sims, -20.0, 0.0)
    nonneg_acc[...] += jnp.sum(neg * neg, keepdims=True)

    # ---- reg 2: patch-usage sparsity on the positive (diagonal) pair ----
    @pl.when(ti == vj)
    def _sparsity():
        e = jnp.exp(sims - max_sims)                               # reuse hoisted max
        probs = e / jnp.sum(e, axis=-1, keepdims=True)             # softmax over NV
        frac = jnp.sum(probs, axis=0, keepdims=True) / float(nt)   # (1, NV)
        excess = jnp.maximum(frac - SPARSITY_THRESH, 0.0)
        sparse_acc[...] += jnp.sum(excess * excess, keepdims=True)

    # ---- last grid step: contrastive loss + regularization finalize ----
    @pl.when(jnp.logical_and(ti == n_ti - 1, vj == n_vj - 1))
    def _finalize():
        clip = clip_ref[...]                                       # (B, B) f32
        row_max = jnp.max(clip, axis=1, keepdims=True)
        lse_row = row_max + jnp.log(
            jnp.sum(jnp.exp(clip - row_max), axis=1, keepdims=True))   # (B, 1)
        col_max = jnp.max(clip, axis=0, keepdims=True)
        lse_col = col_max + jnp.log(
            jnp.sum(jnp.exp(clip - col_max), axis=0, keepdims=True))   # (1, B)
        eye = (lax.broadcasted_iota(jnp.int32, (batch, batch), 0)
               == lax.broadcasted_iota(jnp.int32, (batch, batch), 1)).astype(f32)
        diag_c = jnp.sum(clip * eye, axis=1, keepdims=True)        # (B, 1)
        diag_r = jnp.sum(clip * eye, axis=0, keepdims=True)        # (1, B)
        contrastive = (jnp.sum(lse_row - diag_c, keepdims=True)
                       + jnp.sum(lse_col - diag_r, keepdims=True)) / (2.0 * batch)
        l_nonneg = nonneg_acc[...] / float(batch * batch * nt * nv)
        l_sparse = sparse_acc[...] / float(batch * nv)
        reg = 0.15 * l_nonneg + SPARSITY_WEIGHT * l_sparse
        con_ref[...] = contrastive
        reg_ref[...] = reg
        total_ref[...] = contrastive + reg


# ---------------- pallas_call wrapper ----------------
def _pallas_fused_forward(text2d, mask2d, w_tproj, b_tproj,
                          patches2d, w_patch, b_patch, w_vproj, b_vproj, drop_mask):
    n_txt_rows, h_txt = text2d.shape
    n_vis_rows, pdim = patches2d.shape
    e_vit = w_patch.shape[1]
    d = w_vproj.shape[1]
    batch = n_txt_rows // NT
    assert n_vis_rows == batch * NV

    kernel = functools.partial(_fused_forward_kernel, batch=batch, nt=NT, nv=NV, d=d)

    def const(shape):
        return pl.BlockSpec(shape, lambda ti, vj: tuple(0 for _ in shape))

    grid_spec = pltpu.PrefetchScalarGridSpec(
        num_scalar_prefetch=0,
        grid=(batch, batch),                     # (text-sample tile, visual-sample tile)
        in_specs=[
            pl.BlockSpec((NT, h_txt), lambda ti, vj: (ti, 0)),   # text hidden tile
            pl.BlockSpec((NT, 1), lambda ti, vj: (ti, 0)),       # attention-mask tile
            const((h_txt, d)),                                   # w_tproj
            const((1, d)),                                       # b_tproj
            const((n_vis_rows, pdim)),                           # patches (resident)
            const((pdim, e_vit)),                                # w_patch
            const((1, e_vit)),                                   # b_patch
            const((e_vit, d)),                                   # w_vproj
            const((1, d)),                                       # b_vproj
            const((n_vis_rows, d)),                              # dropout mask
        ],
        out_specs=[
            pl.BlockSpec((NT, NV), lambda ti, vj: (ti, vj)),     # token_sims tile (bf16)
            const((batch, batch)),                               # clip_sims (resident)
            const((1, 1)),                                       # total loss
            const((1, 1)),                                       # contrastive loss
            const((1, 1)),                                       # reg loss
        ],
        scratch_shapes=[
            pltpu.VMEM((batch, NV, d), jnp.bfloat16),   # resident projected visual feats
            pltpu.VMEM((NT, d), jnp.bfloat16),          # projected text tile (reused over vj)
            pltpu.VMEM((1, 1), jnp.float32),            # non-neg penalty partial sum
            pltpu.VMEM((1, 1), jnp.float32),            # sparsity partial sum
        ],
    )
    out_shapes = (
        jax.ShapeDtypeStruct((n_txt_rows, n_vis_rows), jnp.bfloat16),  # token slab
        jax.ShapeDtypeStruct((batch, batch), jnp.float32),             # clip_sims
        jax.ShapeDtypeStruct((1, 1), jnp.float32),                     # total
        jax.ShapeDtypeStruct((1, 1), jnp.float32),                     # contrastive
        jax.ShapeDtypeStruct((1, 1), jnp.float32),                     # reg
    )
    return pl.pallas_call(
        kernel,
        out_shape=out_shapes,
        grid_spec=grid_spec,
        compiler_params=pltpu.CompilerParams(
            # Accumulators carry state across both grid axes -> sequential grid.
            dimension_semantics=("arbitrary", "arbitrary"),
            vmem_limit_bytes=32 * 1024 * 1024,
        ),
    )(text2d, mask2d, w_tproj, b_tproj,
      patches2d, w_patch, b_patch, w_vproj, b_vproj, drop_mask)


# ---------------- glue (plain JAX) ----------------
def patchify(frames):
    """NCHW frames -> (B, Nv, C*P*P) patch vectors."""
    b, c, h, w = frames.shape
    x = frames.reshape(b, c, h // P, P, w // P, P)
    x = x.transpose(0, 2, 4, 1, 3, 5)
    return x.reshape(b, (h // P) * (w // P), c * P * P)


@jax.jit
def text_visual_forward(frames, text_hidden, attention_mask, params, drop_mask):
    # TODO(synk): HF tokenizer + ModernBERT encoder replaced by synthetic hidden
    # states / attention mask (no pretrained checkpoint loading).
    patches = patchify(frames).reshape(B * NV, PDIM)
    text2d = text_hidden.reshape(B * NT, H_TXT)
    mask2d = attention_mask.astype(jnp.float32).reshape(B * NT, 1)
    token_slab, clip_sims, total, con, reg = _pallas_fused_forward(
        text2d, mask2d, params["w_tproj"], params["b_tproj"],
        patches, params["w_patch"], params["b_patch"],
        params["w_vproj"], params["b_vproj"], drop_mask)
    # lane-dense slab -> (B, B, Nt, Nv) view (free layout plumbing in XLA)
    token_sims = token_slab.reshape(B, NT, B, NV).transpose(0, 2, 1, 3)
    return total[0, 0], con[0, 0], reg[0, 0], clip_sims, token_sims


def reference_forward(frames, text_hidden, attention_mask, params, drop_mask):
    """Pure-JAX reference mirroring the PyTorch training path (bf16 MXU inputs)."""
    bf16 = jnp.bfloat16
    mm = lambda a, b: jnp.dot(a.astype(bf16), b.astype(bf16),
                              preferred_element_type=jnp.float32)
    patches = patchify(frames).reshape(B * NV, PDIM)
    h = mm(patches, params["w_patch"]) + params["b_patch"]
    vis = (mm(h, params["w_vproj"]) + params["b_vproj"]) * drop_mask
    visual_feats = vis.astype(bf16).reshape(B, NV, D)
    txt = mm(text_hidden.reshape(B * NT, H_TXT), params["w_tproj"]) + params["b_tproj"]
    text_feats = txt.astype(bf16).reshape(B, NT, D)
    mask_f = attention_mask.astype(jnp.float32)
    token_sims = jnp.einsum("ind,jmd->ijnm", text_feats, visual_feats,
                            preferred_element_type=jnp.float32)
    max_sims = token_sims.max(axis=3)
    mask_e = mask_f[:, None, :]
    clip = (max_sims * mask_e).sum(2) / jnp.clip(mask_e.sum(2), 1e-7, None)
    lse_row = jax.scipy.special.logsumexp(clip, axis=1)
    lse_col = jax.scipy.special.logsumexp(clip, axis=0)
    diag = jnp.diag(clip)
    contrastive = ((lse_row - diag) + (lse_col - diag)).mean() / 2.0
    neg = jnp.clip(token_sims, -20.0, 0.0)
    l_nonneg = jnp.mean(neg ** 2)
    pos = token_sims[jnp.arange(B), jnp.arange(B)]
    probs = jax.nn.softmax(pos, axis=-1)
    frac = probs.sum(axis=1) / NT
    excess = jnp.maximum(frac - SPARSITY_THRESH, 0.0)
    l_sparse = jnp.mean(excess ** 2)
    reg = 0.15 * l_nonneg + SPARSITY_WEIGHT * l_sparse
    return contrastive + reg, contrastive, reg, clip, token_sims


if __name__ == "__main__":
    key = jax.random.PRNGKey(0)
    keys = jax.random.split(key, 8)

    params = {
        "w_patch": 0.02 * jax.random.normal(keys[0], (PDIM, E_VIT), jnp.float32),
        "b_patch": 0.02 * jax.random.normal(keys[1], (1, E_VIT), jnp.float32),
        "w_vproj": 0.02 * jax.random.normal(keys[2], (E_VIT, D), jnp.float32),
        "b_vproj": 0.02 * jax.random.normal(keys[3], (1, D), jnp.float32),
        "w_tproj": 0.02 * jax.random.normal(keys[4], (H_TXT, D), jnp.float32),
        "b_tproj": 0.02 * jax.random.normal(keys[5], (1, D), jnp.float32),
    }

    frames = jax.random.normal(keys[6], (B, C, H, W), jnp.float32)          # NCHW
    text_hidden = jax.random.normal(keys[7], (B, NT, H_TXT), jnp.float32)
    lengths = jnp.array([NT, NT - 5], dtype=jnp.int32)
    attention_mask = (jnp.arange(NT)[None, :] < lengths[:, None]).astype(jnp.int32)
    drop_mask = (jax.random.bernoulli(jax.random.PRNGKey(42), 1.0 - DROPOUT_P,
                                      (B * NV, D)).astype(jnp.float32)
                 / (1.0 - DROPOUT_P))

    total, con, reg, clip_sims, token_sims = jax.block_until_ready(
        text_visual_forward(frames, text_hidden, attention_mask, params, drop_mask))

    ref_total, ref_con, ref_reg, ref_clip, ref_tok = reference_forward(
        frames, text_hidden, attention_mask, params, drop_mask)

    tok_f32 = token_sims.astype(jnp.float32)
    assert bool(jnp.isfinite(total)), "non-finite loss"
    assert jnp.allclose(tok_f32, ref_tok, rtol=2e-2, atol=2e-3), \
        float(jnp.max(jnp.abs(tok_f32 - ref_tok)))
    assert jnp.allclose(clip_sims, ref_clip, rtol=1e-2, atol=1e-3)
    assert jnp.allclose(total, ref_total, rtol=1e-2, atol=1e-3), (float(total), float(ref_total))
    assert jnp.allclose(con, ref_con, rtol=1e-2, atol=1e-3), (float(con), float(ref_con))
    assert jnp.allclose(reg, ref_reg, rtol=5e-2, atol=1e-4), (float(reg), float(ref_reg))

    print("KERNEL_OK")
</pallas_src>

<mosaic_0001>
module attributes {stable_mosaic.version = 11 : i64} {
  func.func @_fused_forward_kernel(%arg0: i32, %arg1: i32, %arg2: memref<16x128xf32, #tpu.memory_space<vmem>>, %arg3: memref<16x1xf32, #tpu.memory_space<vmem>>, %arg4: memref<128x128xf32, #tpu.memory_space<vmem>>, %arg5: memref<1x128xf32, #tpu.memory_space<vmem>>, %arg6: memref<512x16xf32, #tpu.memory_space<vmem>>, %arg7: memref<16x128xf32, #tpu.memory_space<vmem>>, %arg8: memref<1x128xf32, #tpu.memory_space<vmem>>, %arg9: memref<128x128xf32, #tpu.memory_space<vmem>>, %arg10: memref<1x128xf32, #tpu.memory_space<vmem>>, %arg11: memref<512x128xf32, #tpu.memory_space<vmem>>, %arg12: memref<16x256xbf16, #tpu.memory_space<vmem>>, %arg13: memref<2x2xf32, #tpu.memory_space<vmem>>, %arg14: memref<1x1xf32, #tpu.memory_space<vmem>>, %arg15: memref<1x1xf32, #tpu.memory_space<vmem>>, %arg16: memref<1x1xf32, #tpu.memory_space<vmem>>, %arg17: memref<2x256x128xbf16, #tpu.memory_space<vmem>>, %arg18: memref<16x128xbf16, #tpu.memory_space<vmem>>, %arg19: memref<1x1xf32, #tpu.memory_space<vmem>>, %arg20: memref<1x1xf32, #tpu.memory_space<vmem>>) attributes {dimension_semantics = [#tpu.dimension_semantics<arbitrary>, #tpu.dimension_semantics<arbitrary>], iteration_bounds = array<i64: 2, 2>, scalar_prefetch = 0 : i64, scratch_operands = 4 : i64, tpu.core_type = #tpu.core_type<tc>, window_params = [{transform_indices = @transform_0, window_bounds = array<i64: 16, 128>}, {transform_indices = @transform_1, window_bounds = array<i64: 16, 1>}, {pipeline_mode = #tpu.pipeline_mode<synchronous>, transform_indices = @transform_2, window_bounds = array<i64: 128, 128>}, {pipeline_mode = #tpu.pipeline_mode<synchronous>, transform_indices = @transform_3, window_bounds = array<i64: 1, 128>}, {pipeline_mode = #tpu.pipeline_mode<synchronous>, transform_indices = @transform_4, window_bounds = array<i64: 512, 16>}, {pipeline_mode = #tpu.pipeline_mode<synchronous>, transform_indices = @transform_5, window_bounds = array<i64: 16, 128>}, {pipeline_mode = #tpu.pipeline_mode<synchronous>, transform_indices = @transform_6, window_bounds = array<i64: 1, 128>}, {pipeline_mode = #tpu.pipeline_mode<synchronous>, transform_indices = @transform_7, window_bounds = array<i64: 128, 128>}, {pipeline_mode = #tpu.pipeline_mode<synchronous>, transform_indices = @transform_8, window_bounds = array<i64: 1, 128>}, {pipeline_mode = #tpu.pipeline_mode<synchronous>, transform_indices = @transform_9, window_bounds = array<i64: 512, 128>}, {transform_indices = @transform_10, window_bounds = array<i64: 16, 256>}, {pipeline_mode = #tpu.pipeline_mode<synchronous>, transform_indices = @transform_11, window_bounds = array<i64: 2, 2>}, {pipeline_mode = #tpu.pipeline_mode<synchronous>, transform_indices = @transform_12, window_bounds = array<i64: 1, 1>}, {pipeline_mode = #tpu.pipeline_mode<synchronous>, transform_indices = @transform_13, window_bounds = array<i64: 1, 1>}, {pipeline_mode = #tpu.pipeline_mode<synchronous>, transform_indices = @transform_14, window_bounds = array<i64: 1, 1>}]} {
    %c0_i32 = arith.constant 0 : i32
    %0 = arith.cmpi eq, %arg0, %c0_i32 : i32
    %c0_i32_0 = arith.constant 0 : i32
    %1 = arith.cmpi eq, %arg1, %c0_i32_0 : i32
    %2 = arith.andi %0, %1 : i1
    %3 = arith.extui %2 : i1 to i32
    %c0_i32_1 = arith.constant 0 : i32
    %4 = arith.cmpi ne, %3, %c0_i32_1 : i32
    scf.if %4 {
      %c0_29 = arith.constant 0 : index
      %c0_30 = arith.constant 0 : index
      %71 = vector.load %arg6[%c0_29, %c0_30] : memref<512x16xf32, #tpu.memory_space<vmem>>, vector<512x16xf32>
      %72 = arith.truncf %71 : vector<512x16xf32> to vector<512x16xbf16>
      %c0_31 = arith.constant 0 : index
      %c0_32 = arith.constant 0 : index
      %73 = vector.load %arg7[%c0_31, %c0_32] : memref<16x128xf32, #tpu.memory_space<vmem>>, vector<16x128xf32>
      %74 = arith.truncf %73 : vector<16x128xf32> to vector<16x128xbf16>
      %cst_33 = arith.constant dense<0.000000e+00> : vector<512x128xf32>
      %75 = tpu.matmul %72, %74, %cst_33 {dimension_numbers = #tpu.dot_dimension_numbers<[1], [0], [0], [1], [0, 0, 1, 1], [], []>} : vector<512x16xbf16>, vector<16x128xbf16>, vector<512x128xf32> -> vector<512x128xf32>
      %c0_34 = arith.constant 0 : index
      %c0_35 = arith.constant 0 : index
      %76 = vector.load %arg8[%c0_34, %c0_35] : memref<1x128xf32, #tpu.memory_space<vmem>>, vector<1x128xf32>
      %77 = vector.broadcast %76 : vector<1x128xf32> to vector<512x128xf32>
      %78 = arith.addf %75, %77 : vector<512x128xf32>
      %79 = arith.truncf %78 : vector<512x128xf32> to vector<512x128xbf16>
      %c0_36 = arith.constant 0 : index
      %c0_37 = arith.constant 0 : index
      %80 = vector.load %arg9[%c0_36, %c0_37] : memref<128x128xf32, #tpu.memory_space<vmem>>, vector<128x128xf32>
      %81 = arith.truncf %80 : vector<128x128xf32> to vector<128x128xbf16>
      %cst_38 = arith.constant dense<0.000000e+00> : vector<512x128xf32>
      %82 = tpu.matmul %79, %81, %cst_38 {dimension_numbers = #tpu.dot_dimension_numbers<[1], [0], [0], [1], [0, 0, 1, 1], [], []>} : vector<512x128xbf16>, vector<128x128xbf16>, vector<512x128xf32> -> vector<512x128xf32>
      %c0_39 = arith.constant 0 : index
      %c0_40 = arith.constant 0 : index
      %83 = vector.load %arg10[%c0_39, %c0_40] : memref<1x128xf32, #tpu.memory_space<vmem>>, vector<1x128xf32>
      %84 = vector.broadcast %83 : vector<1x128xf32> to vector<512x128xf32>
      %85 = arith.addf %82, %84 : vector<512x128xf32>
      %c0_41 = arith.constant 0 : index
      %c0_42 = arith.constant 0 : index
      %86 = vector.load %arg11[%c0_41, %c0_42] : memref<512x128xf32, #tpu.memory_space<vmem>>, vector<512x128xf32>
      %87 = arith.mulf %85, %86 : vector<512x128xf32>
      %88 = arith.truncf %87 : vector<512x128xf32> to vector<512x128xbf16>
      %89 = vector.shape_cast %88 : vector<512x128xbf16> to vector<2x256x128xbf16>
      %c0_43 = arith.constant 0 : index
      %c0_44 = arith.constant 0 : index
      %c0_45 = arith.constant 0 : index
      %90 = vector.load %arg17[%c0_43, %c0_44, %c0_45] : memref<2x256x128xbf16, #tpu.memory_space<vmem>>, vector<2x256x128xbf16>
      tpu.vector_store %arg17[%c0_43, %c0_44, %c0_45], %89 {strides = array<i32>} : memref<2x256x128xbf16, #tpu.memory_space<vmem>>, vector<2x256x128xbf16>,
      %cst_46 = arith.constant 0.000000e+00 : f32
      %91 = vector.broadcast %cst_46 : f32 to vector<2x2xf32>
      %c0_47 = arith.constant 0 : index
      %c0_48 = arith.constant 0 : index
      %92 = vector.load %arg13[%c0_47, %c0_48] : memref<2x2xf32, #tpu.memory_space<vmem>>, vector<2x2xf32>
      tpu.vector_store %arg13[%c0_47, %c0_48], %91 {strides = array<i32>} : memref<2x2xf32, #tpu.memory_space<vmem>>, vector<2x2xf32>,
      %cst_49 = arith.constant 0.000000e+00 : f32
      %93 = vector.broadcast %cst_49 : f32 to vector<1x1xf32>
      %c0_50 = arith.constant 0 : index
      %c0_51 = arith.constant 0 : index
      %94 = vector.load %arg14[%c0_50, %c0_51] : memref<1x1xf32, #tpu.memory_space<vmem>>, vector<1x1xf32>
      tpu.vector_store %arg14[%c0_50, %c0_51], %93 {strides = array<i32>} : memref<1x1xf32, #tpu.memory_space<vmem>>, vector<1x1xf32>,
      %cst_52 = arith.constant 0.000000e+00 : f32
      %95 = vector.broadcast %cst_52 : f32 to vector<1x1xf32>
      %c0_53 = arith.constant 0 : index
      %c0_54 = arith.constant 0 : index
      %96 = vector.load %arg15[%c0_53, %c0_54] : memref<1x1xf32, #tpu.memory_space<vmem>>, vector<1x1xf32>
      tpu.vector_store %arg15[%c0_53, %c0_54], %95 {strides = array<i32>} : memref<1x1xf32, #tpu.memory_space<vmem>>, vector<1x1xf32>,
      %cst_55 = arith.constant 0.000000e+00 : f32
      %97 = vector.broadcast %cst_55 : f32 to vector<1x1xf32>
      %c0_56 = arith.constant 0 : index
      %c0_57 = arith.constant 0 : index
      %98 = vector.load %arg16[%c0_56, %c0_57] : memref<1x1xf32, #tpu.memory_space<vmem>>, vector<1x1xf32>
      tpu.vector_store %arg16[%c0_56, %c0_57], %97 {strides = array<i32>} : memref<1x1xf32, #tpu.memory_space<vmem>>, vector<1x1xf32>,
      %cst_58 = arith.constant 0.000000e+00 : f32
      %99 = vector.broadcast %cst_58 : f32 to vector<1x1xf32>
      %c0_59 = arith.constant 0 : index
      %c0_60 = arith.constant 0 : index
      %100 = vector.load %arg19[%c0_59, %c0_60] : memref<1x1xf32, #tpu.memory_space<vmem>>, vector<1x1xf32>
      tpu.vector_store %arg19[%c0_59, %c0_60], %99 {strides = array<i32>} : memref<1x1xf32, #tpu.memory_space<vmem>>, vector<1x1xf32>,
      %cst_61 = arith.constant 0.000000e+00 : f32
      %101 = vector.broadcast %cst_61 : f32 to vector<1x1xf32>
      %c0_62 = arith.constant 0 : index
      %c0_63 = arith.constant 0 : index
      %102 = vector.load %arg20[%c0_62, %c0_63] : memref<1x1xf32, #tpu.memory_space<vmem>>, vector<1x1xf32>
      tpu.vector_store %arg20[%c0_62, %c0_63], %101 {strides = array<i32>} : memref<1x1xf32, #tpu.memory_space<vmem>>, vector<1x1xf32>,
    } else {
    }
    %c0_i32_2 = arith.constant 0 : i32
    %5 = arith.cmpi eq, %arg1, %c0_i32_2 : i32
    %6 = arith.extui %5 : i1 to i32
    %c0_i32_3 = arith.constant 0 : i32
    %7 = arith.cmpi ne, %6, %c0_i32_3 : i32
    scf.if %7 {
      %c0_29 = arith.constant 0 : index
      %c0_30 = arith.constant 0 : index
      %71 = vector.load %arg2[%c0_29, %c0_30] : memref<16x128xf32, #tpu.memory_space<vmem>>, vector<16x128xf32>
      %72 = arith.truncf %71 : vector<16x128xf32> to vector<16x128xbf16>
      %c0_31 = arith.constant 0 : index
      %c0_32 = arith.constant 0 : index
      %73 = vector.load %arg4[%c0_31, %c0_32] : memref<128x128xf32, #tpu.memory_space<vmem>>, vector<128x128xf32>
      %74 = arith.truncf %73 : vector<128x128xf32> to vector<128x128xbf16>
      %cst_33 = arith.constant dense<0.000000e+00> : vector<16x128xf32>
      %75 = tpu.matmul %72, %74, %cst_33 {dimension_numbers = #tpu.dot_dimension_numbers<[1], [0], [0], [1], [0, 0, 1, 1], [], []>} : vector<16x128xbf16>, vector<128x128xbf16>, vector<16x128xf32> -> vector<16x128xf32>
      %c0_34 = arith.constant 0 : index
      %c0_35 = arith.constant 0 : index
      %76 = vector.load %arg5[%c0_34, %c0_35] : memref<1x128xf32, #tpu.memory_space<vmem>>, vector<1x128xf32>
      %77 = vector.broadcast %76 : vector<1x128xf32> to vector<16x128xf32>
      %78 = arith.addf %75, %77 : vector<16x128xf32>
      %79 = arith.truncf %78 : vector<16x128xf32> to vector<16x128xbf16>
      %c0_36 = arith.constant 0 : index
      %c0_37 = arith.constant 0 : index
      %80 = vector.load %arg18[%c0_36, %c0_37] : memref<16x128xbf16, #tpu.memory_space<vmem>>, vector<16x128xbf16>
      tpu.vector_store %arg18[%c0_36, %c0_37], %79 {strides = array<i32>} : memref<16x128xbf16, #tpu.memory_space<vmem>>, vector<16x128xbf16>,
    } else {
    }
    %c0 = arith.constant 0 : index
    %c0_4 = arith.constant 0 : index
    %8 = vector.load %arg18[%c0, %c0_4] : memref<16x128xbf16, #tpu.memory_space<vmem>>, vector<16x128xbf16>
    %9 = arith.index_cast %arg1 : i32 to index
    %c0_5 = arith.constant 0 : index
    %c0_6 = arith.constant 0 : index
    %10 = vector.load %arg17[%9, %c0_5, %c0_6] : memref<2x256x128xbf16, #tpu.memory_space<vmem>>, vector<1x256x128xbf16>
    %11 = vector.shape_cast %10 : vector<1x256x128xbf16> to vector<256x128xbf16>
    %cst = arith.constant dense<0.000000e+00> : vector<16x256xf32>
    %12 = tpu.matmul %8, %11, %cst {dimension_numbers = #tpu.dot_dimension_numbers<[1], [1], [0], [0], [0, 0, 1, 0], [], []>} : vector<16x128xbf16>, vector<256x128xbf16>, vector<16x256xf32> -> vector<16x256xf32>
    %13 = arith.truncf %12 : vector<16x256xf32> to vector<16x256xbf16>
    %c0_7 = arith.constant 0 : index
    %c0_8 = arith.constant 0 : index
    %14 = vector.load %arg12[%c0_7, %c0_8] : memref<16x256xbf16, #tpu.memory_space<vmem>>, vector<16x256xbf16>
    tpu.vector_store %arg12[%c0_7, %c0_8], %13 {strides = array<i32>} : memref<16x256xbf16, #tpu.memory_space<vmem>>, vector<16x256xbf16>,
    %c0_9 = arith.constant 0 : index
    %c0_10 = arith.constant 0 : index
    %15 = vector.load %arg3[%c0_9, %c0_10] : memref<16x1xf32, #tpu.memory_space<vmem>>, vector<16x1xf32>
    %cst_11 = arith.constant dense<0xFF800000> : vector<16xf32>
    %16 = vector.multi_reduction <maximumf>, %12, %cst_11 [1] : vector<16x256xf32> to vector<16xf32>
    %17 = vector.shape_cast %16 : vector<16xf32> to vector<16x1xf32>
    %18 = arith.mulf %17, %15 : vector<16x1xf32>
    %19 = vector.shape_cast %18 : vector<16x1xf32> to vector<1x16x1xf32>
    %cst_12 = arith.constant dense<0.000000e+00> : vector<1xf32>
    %20 = vector.multi_reduction <add>, %19, %cst_12 [1, 2] : vector<1x16x1xf32> to vector<1xf32>
    %21 = vector.shape_cast %20 : vector<1xf32> to vector<1x1x1xf32>
    %22 = vector.extract %21[0, 0, 0] : f32 from vector<1x1x1xf32>
    %23 = vector.broadcast %22 : f32 to vector<1x1xf32>
    %24 = vector.shape_cast %15 : vector<16x1xf32> to vector<1x16x1xf32>
    %cst_13 = arith.constant dense<0.000000e+00> : vector<1xf32>
    %25 = vector.multi_reduction <add>, %24, %cst_13 [1, 2] : vector<1x16x1xf32> to vector<1xf32>
    %26 = vector.shape_cast %25 : vector<1xf32> to vector<1x1x1xf32>
    %27 = vector.extract %26[0, 0, 0] : f32 from vector<1x1x1xf32>
    %28 = vector.broadcast %27 : f32 to vector<1x1xf32>
    %cst_14 = arith.constant 1.000000e-07 : f32
    %29 = vector.broadcast %cst_14 : f32 to vector<1x1xf32>
    %30 = arith.maximumf %28, %29 : vector<1x1xf32>
    %31 = tpu.iota {dimensions = array<i32: 0>} : vector<2x1xi32>
    %32 = vector.broadcast %arg0 : i32 to vector<2x1xi32>
    %33 = arith.cmpi eq, %31, %32 : vector<2x1xi32>
    %34 = arith.extui %33 : vector<2x1xi1> to vector<2x1xi32>
    %35 = arith.sitofp %34 : vector<2x1xi32> to vector<2x1xf32>
    %36 = tpu.iota {dimensions = array<i32: 1>} : vector<1x2xi32>
    %37 = vector.broadcast %arg1 : i32 to vector<1x2xi32>
    %38 = arith.cmpi eq, %36, %37 : vector<1x2xi32>
    %39 = arith.extui %38 : vector<1x2xi1> to vector<1x2xi32>
    %40 = arith.sitofp %39 : vector<1x2xi32> to vector<1x2xf32>
    %c0_15 = arith.constant 0 : index
    %c0_16 = arith.constant 0 : index
    %41 = vector.load %arg13[%c0_15, %c0_16] : memref<2x2xf32, #tpu.memory_space<vmem>>, vector<2x2xf32>
    %42 = vector.broadcast %35 : vector<2x1xf32> to vector<2x2xf32>
    %43 = vector.broadcast %40 : vector<1x2xf32> to vector<2x2xf32>
    %44 = arith.mulf %42, %43 : vector<2x2xf32>
    %45 = arith.divf %23, %30 : vector<1x1xf32>
    %46 = vector.broadcast %45 : vector<1x1xf32> to vector<2x2xf32>
    %47 = arith.mulf %44, %46 : vector<2x2xf32>
    %48 = arith.addf %41, %47 : vector<2x2xf32>
    %c0_17 = arith.constant 0 : index
    %c0_18 = arith.constant 0 : index
    %49 = vector.load %arg13[%c0_17, %c0_18] : memref<2x2xf32, #tpu.memory_space<vmem>>, vector<2x2xf32>
    tpu.vector_store %arg13[%c0_17, %c0_18], %48 {strides = array<i32>} : memref<2x2xf32, #tpu.memory_space<vmem>>, vector<2x2xf32>,
    %cst_19 = arith.constant -2.000000e+01 : f32
    %cst_20 = arith.constant 0.000000e+00 : f32
    %50 = vector.broadcast %cst_19 : f32 to vector<16x256xf32>
    %51 = arith.maximumf %50, %12 : vector<16x256xf32>
    %52 = vector.broadcast %cst_20 : f32 to vector<16x256xf32>
    %53 = arith.minimumf %52, %51 : vector<16x256xf32>
    %c0_21 = arith.constant 0 : index
    %c0_22 = arith.constant 0 : index
    %54 = vector.load %arg19[%c0_21, %c0_22] : memref<1x1xf32, #tpu.memory_space<vmem>>, vector<1x1xf32>
    %55 = arith.mulf %53, %53 : vector<16x256xf32>
    %56 = vector.shape_cast %55 : vector<16x256xf32> to vector<1x16x256xf32>
    %cst_23 = arith.constant dense<0.000000e+00> : vector<1xf32>
    %57 = vector.multi_reduction <add>, %56, %cst_23 [1, 2] : vector<1x16x256xf32> to vector<1xf32>
    %58 = vector.shape_cast %57 : vector<1xf32> to vector<1x1x1xf32>
    %59 = vector.extract %58[0, 0, 0] : f32 from vector<1x1x1xf32>
    %60 = vector.broadcast %59 : f32 to vector<1x1xf32>
    %61 = arith.addf %54, %60 : vector<1x1xf32>
    %c0_24 = arith.constant 0 : index
    %c0_25 = arith.constant 0 : index
    %62 = vector.load %arg19[%c0_24, %c0_25] : memref<1x1xf32, #tpu.memory_space<vmem>>, vector<1x1xf32>
    tpu.vector_store %arg19[%c0_24, %c0_25], %61 {strides = array<i32>} : memref<1x1xf32, #tpu.memory_space<vmem>>, vector<1x1xf32>,
    %63 = arith.cmpi eq, %arg0, %arg1 : i32
    %64 = arith.extui %63 : i1 to i32
    %c0_i32_26 = arith.constant 0 : i32
    %65 = arith.cmpi ne, %64, %c0_i32_26 : i32
    scf.if %65 {
      %71 = vector.broadcast %17 : vector<16x1xf32> to vector<16x256xf32>
      %72 = arith.subf %12, %71 : vector<16x256xf32>
      %73 = math.exp %72 : vector<16x256xf32>
      %cst_29 = arith.constant dense<0.000000e+00> : vector<16xf32>
      %74 = vector.multi_reduction <add>, %73, %cst_29 [1] : vector<16x256xf32> to vector<16xf32>
      %75 = vector.shape_cast %74 : vector<16xf32> to vector<16x1xf32>
      %76 = vector.broadcast %75 : vector<16x1xf32> to vector<16x256xf32>
      %77 = arith.divf %73, %76 : vector<16x256xf32>
      %cst_30 = arith.constant dense<0.000000e+00> : vector<256xf32>
      %78 = vector.multi_reduction <add>, %77, %cst_30 [0] : vector<16x256xf32> to vector<256xf32>
      %79 = vector.shape_cast %78 : vector<256xf32> to vector<1x256xf32>
      %cst_31 = arith.constant 1.600000e+01 : f32
      %80 = vector.broadcast %cst_31 : f32 to vector<1x256xf32>
      %81 = arith.divf %79, %80 : vector<1x256xf32>
      %cst_32 = arith.constant 3.000000e-01 : f32
      %82 = vector.broadcast %cst_32 : f32 to vector<1x256xf32>
      %83 = arith.subf %81, %82 : vector<1x256xf32>
      %cst_33 = arith.constant 0.000000e+00 : f32
      %84 = vector.broadcast %cst_33 : f32 to vector<1x256xf32>
      %85 = arith.maximumf %83, %84 : vector<1x256xf32>
      %c0_34 = arith.constant 0 : index
      %c0_35 = arith.constant 0 : index
      %86 = vector.load %arg20[%c0_34, %c0_35] : memref<1x1xf32, #tpu.memory_space<vmem>>, vector<1x1xf32>
      %87 = arith.mulf %85, %85 : vector<1x256xf32>
      %88 = vector.shape_cast %87 : vector<1x256xf32> to vector<1x1x256xf32>
      %cst_36 = arith.constant dense<0.000000e+00> : vector<1xf32>
      %89 = vector.multi_reduction <add>, %88, %cst_36 [1, 2] : vector<1x1x256xf32> to vector<1xf32>
      %90 = vector.shape_cast %89 : vector<1xf32> to vector<1x1x1xf32>
      %91 = vector.extract %90[0, 0, 0] : f32 from vector<1x1x1xf32>
      %92 = vector.broadcast %91 : f32 to vector<1x1xf32>
      %93 = arith.addf %86, %92 : vector<1x1xf32>
      %c0_37 = arith.constant 0 : index
      %c0_38 = arith.constant 0 : index
      %94 = vector.load %arg20[%c0_37, %c0_38] : memref<1x1xf32, #tpu.memory_space<vmem>>, vector<1x1xf32>
      tpu.vector_store %arg20[%c0_37, %c0_38], %93 {strides = array<i32>} : memref<1x1xf32, #tpu.memory_space<vmem>>, vector<1x1xf32>,
    } else {
    }
    %c1_i32 = arith.constant 1 : i32
    %66 = arith.cmpi eq, %arg0, %c1_i32 : i32
    %c1_i32_27 = arith.constant 1 : i32
    %67 = arith.cmpi eq, %arg1, %c1_i32_27 : i32
    %68 = arith.andi %66, %67 : i1
    %69 = arith.extui %68 : i1 to i32
    %c0_i32_28 = arith.constant 0 : i32
    %70 = arith.cmpi ne, %69, %c0_i32_28 : i32
    scf.if %70 {
      %c0_29 = arith.constant 0 : index
      %c0_30 = arith.constant 0 : index
      %71 = vector.load %arg13[%c0_29, %c0_30] : memref<2x2xf32, #tpu.memory_space<vmem>>, vector<2x2xf32>
      %cst_31 = arith.constant dense<0xFF800000> : vector<2xf32>
      %72 = vector.multi_reduction <maximumf>, %71, %cst_31 [1] : vector<2x2xf32> to vector<2xf32>
      %73 = vector.shape_cast %72 : vector<2xf32> to vector<2x1xf32>
      %74 = vector.broadcast %73 : vector<2x1xf32> to vector<2x2xf32>
      %75 = arith.subf %71, %74 : vector<2x2xf32>
      %76 = math.exp %75 : vector<2x2xf32>
      %cst_32 = arith.constant dense<0.000000e+00> : vector<2xf32>
      %77 = vector.multi_reduction <add>, %76, %cst_32 [1] : vector<2x2xf32> to vector<2xf32>
      %78 = vector.shape_cast %77 : vector<2xf32> to vector<2x1xf32>
      %79 = math.log %78 : vector<2x1xf32>
      %80 = arith.addf %73, %79 : vector<2x1xf32>
      %cst_33 = arith.constant dense<0xFF800000> : vector<2xf32>
      %81 = vector.multi_reduction <maximumf>, %71, %cst_33 [0] : vector<2x2xf32> to vector<2xf32>
      %82 = vector.shape_cast %81 : vector<2xf32> to vector<1x2xf32>
      %83 = vector.broadcast %82 : vector<1x2xf32> to vector<2x2xf32>
      %84 = arith.subf %71, %83 : vector<2x2xf32>
      %85 = math.exp %84 : vector<2x2xf32>
      %cst_34 = arith.constant dense<0.000000e+00> : vector<2xf32>
      %86 = vector.multi_reduction <add>, %85, %cst_34 [0] : vector<2x2xf32> to vector<2xf32>
      %87 = vector.shape_cast %86 : vector<2xf32> to vector<1x2xf32>
      %88 = math.log %87 : vector<1x2xf32>
      %89 = arith.addf %82, %88 : vector<1x2xf32>
      %90 = tpu.iota {dimensions = array<i32: 0>} : vector<2x2xi32>
      %91 = tpu.iota {dimensions = array<i32: 1>} : vector<2x2xi32>
      %92 = arith.cmpi eq, %90, %91 : vector<2x2xi32>
      %93 = arith.extui %92 : vector<2x2xi1> to vector<2x2xi32>
      %94 = arith.sitofp %93 : vector<2x2xi32> to vector<2x2xf32>
      %95 = arith.mulf %71, %94 : vector<2x2xf32>
      %cst_35 = arith.constant dense<0.000000e+00> : vector<2xf32>
      %96 = vector.multi_reduction <add>, %95, %cst_35 [1] : vector<2x2xf32> to vector<2xf32>
      %97 = vector.shape_cast %96 : vector<2xf32> to vector<2x1xf32>
      %98 = arith.mulf %71, %94 : vector<2x2xf32>
      %cst_36 = arith.constant dense<0.000000e+00> : vector<2xf32>
      %99 = vector.multi_reduction <add>, %98, %cst_36 [0] : vector<2x2xf32> to vector<2xf32>
      %100 = vector.shape_cast %99 : vector<2xf32> to vector<1x2xf32>
      %101 = arith.subf %80, %97 : vector<2x1xf32>
      %102 = vector.shape_cast %101 : vector<2x1xf32> to vector<1x2x1xf32>
      %cst_37 = arith.constant dense<0.000000e+00> : vector<1xf32>
      %103 = vector.multi_reduction <add>, %102, %cst_37 [1, 2] : vector<1x2x1xf32> to vector<1xf32>
      %104 = vector.shape_cast %103 : vector<1xf32> to vector<1x1x1xf32>
      %105 = vector.extract %104[0, 0, 0] : f32 from vector<1x1x1xf32>
      %106 = vector.broadcast %105 : f32 to vector<1x1xf32>
      %107 = arith.subf %89, %100 : vector<1x2xf32>
      %108 = vector.shape_cast %107 : vector<1x2xf32> to vector<1x1x2xf32>
      %cst_38 = arith.constant dense<0.000000e+00> : vector<1xf32>
      %109 = vector.multi_reduction <add>, %108, %cst_38 [1, 2] : vector<1x1x2xf32> to vector<1xf32>
      %110 = vector.shape_cast %109 : vector<1xf32> to vector<1x1x1xf32>
      %111 = vector.extract %110[0, 0, 0] : f32 from vector<1x1x1xf32>
      %112 = vector.broadcast %111 : f32 to vector<1x1xf32>
      %113 = arith.addf %106, %112 : vector<1x1xf32>
      %cst_39 = arith.constant 4.000000e+00 : f32
      %114 = vector.broadcast %cst_39 : f32 to vector<1x1xf32>
      %115 = arith.divf %113, %114 : vector<1x1xf32>
      %c0_40 = arith.constant 0 : index
      %c0_41 = arith.constant 0 : index
      %116 = vector.load %arg19[%c0_40, %c0_41] : memref<1x1xf32, #tpu.memory_space<vmem>>, vector<1x1xf32>
      %cst_42 = arith.constant 1.638400e+04 : f32
      %117 = vector.broadcast %cst_42 : f32 to vector<1x1xf32>
      %118 = arith.divf %116, %117 : vector<1x1xf32>
      %c0_43 = arith.constant 0 : index
      %c0_44 = arith.constant 0 : index
      %119 = vector.load %arg20[%c0_43, %c0_44] : memref<1x1xf32, #tpu.memory_space<vmem>>, vector<1x1xf32>
      %cst_45 = arith.constant 5.120000e+02 : f32
      %120 = vector.broadcast %cst_45 : f32 to vector<1x1xf32>
      %121 = arith.divf %119, %120 : vector<1x1xf32>
      %cst_46 = arith.constant 1.500000e-01 : f32
      %122 = vector.broadcast %cst_46 : f32 to vector<1x1xf32>
      %123 = arith.mulf %122, %118 : vector<1x1xf32>
      %cst_47 = arith.constant 1.000000e-01 : f32
      %124 = vector.broadcast %cst_47 : f32 to vector<1x1xf32>
      %125 = arith.mulf %124, %121 : vector<1x1xf32>
      %126 = arith.addf %123, %125 : vector<1x1xf32>
      %c0_48 = arith.constant 0 : index
      %c0_49 = arith.constant 0 : index
      %127 = vector.load %arg15[%c0_48, %c0_49] : memref<1x1xf32, #tpu.memory_space<vmem>>, vector<1x1xf32>
      tpu.vector_store %arg15[%c0_48, %c0_49], %115 {strides = array<i32>} : memref<1x1xf32, #tpu.memory_space<vmem>>, vector<1x1xf32>,
      %c0_50 = arith.constant 0 : index
      %c0_51 = arith.constant 0 : index
      %128 = vector.load %arg16[%c0_50, %c0_51] : memref<1x1xf32, #tpu.memory_space<vmem>>, vector<1x1xf32>
      tpu.vector_store %arg16[%c0_50, %c0_51], %126 {strides = array<i32>} : memref<1x1xf32, #tpu.memory_space<vmem>>, vector<1x1xf32>,
      %129 = arith.addf %115, %126 : vector<1x1xf32>
      %c0_52 = arith.constant 0 : index
      %c0_53 = arith.constant 0 : index
      %130 = vector.load %arg14[%c0_52, %c0_53] : memref<1x1xf32, #tpu.memory_space<vmem>>, vector<1x1xf32>
      tpu.vector_store %arg14[%c0_52, %c0_53], %129 {strides = array<i32>} : memref<1x1xf32, #tpu.memory_space<vmem>>, vector<1x1xf32>,
    } else {
    }
    return
  }
  func.func @transform_0(%arg0: i32, %arg1: i32) -> (i32, i32) {
    %c0_i32 = arith.constant 0 : i32
    %c0_i32_0 = arith.constant 0 : i32
    return %arg0, %c0_i32 : i32, i32
  }
  func.func @transform_1(%arg0: i32, %arg1: i32) -> (i32, i32) {
    %c0_i32 = arith.constant 0 : i32
    %c0_i32_0 = arith.constant 0 : i32
    return %arg0, %c0_i32 : i32, i32
  }
  func.func @transform_2(%arg0: i32, %arg1: i32) -> (i32, i32) {
    %c0_i32 = arith.constant 0 : i32
    %c0_i32_0 = arith.constant 0 : i32
    %c0_i32_1 = arith.constant 0 : i32
    return %c0_i32, %c0_i32_0 : i32, i32
  }
  func.func @transform_3(%arg0: i32, %arg1: i32) -> (i32, i32) {
    %c0_i32 = arith.constant 0 : i32
    %c0_i32_0 = arith.constant 0 : i32
    %c0_i32_1 = arith.constant 0 : i32
    return %c0_i32, %c0_i32_0 : i32, i32
  }
  func.func @transform_4(%arg0: i32, %arg1: i32) -> (i32, i32) {
    %c0_i32 = arith.constant 0 : i32
    %c0_i32_0 = arith.constant 0 : i32
    %c0_i32_1 = arith.constant 0 : i32
    return %c0_i32, %c0_i32_0 : i32, i32
  }
  func.func @transform_5(%arg0: i32, %arg1: i32) -> (i32, i32) {
    %c0_i32 = arith.constant 0 : i32
    %c0_i32_0 = arith.constant 0 : i32
    %c0_i32_1 = arith.constant 0 : i32
    return %c0_i32, %c0_i32_0 : i32, i32
  }
  func.func @transform_6(%arg0: i32, %arg1: i32) -> (i32, i32) {
    %c0_i32 = arith.constant 0 : i32
    %c0_i32_0 = arith.constant 0 : i32
    %c0_i32_1 = arith.constant 0 : i32
    return %c0_i32, %c0_i32_0 : i32, i32
  }
  func.func @transform_7(%arg0: i32, %arg1: i32) -> (i32, i32) {
    %c0_i32 = arith.constant 0 : i32
    %c0_i32_0 = arith.constant 0 : i32
    %c0_i32_1 = arith.constant 0 : i32
    return %c0_i32, %c0_i32_0 : i32, i32
  }
  func.func @transform_8(%arg0: i32, %arg1: i32) -> (i32, i32) {
    %c0_i32 = arith.constant 0 : i32
    %c0_i32_0 = arith.constant 0 : i32
    %c0_i32_1 = arith.constant 0 : i32
    return %c0_i32, %c0_i32_0 : i32, i32
  }
  func.func @transform_9(%arg0: i32, %arg1: i32) -> (i32, i32) {
    %c0_i32 = arith.constant 0 : i32
    %c0_i32_0 = arith.constant 0 : i32
    %c0_i32_1 = arith.constant 0 : i32
    return %c0_i32, %c0_i32_0 : i32, i32
  }
  func.func @transform_10(%arg0: i32, %arg1: i32) -> (i32, i32) {
    %c0_i32 = arith.constant 0 : i32
    return %arg0, %arg1 : i32, i32
  }
  func.func @transform_11(%arg0: i32, %arg1: i32) -> (i32, i32) {
    %c0_i32 = arith.constant 0 : i32
    %c0_i32_0 = arith.constant 0 : i32
    %c0_i32_1 = arith.constant 0 : i32
    return %c0_i32, %c0_i32_0 : i32, i32
  }
  func.func @transform_12(%arg0: i32, %arg1: i32) -> (i32, i32) {
    %c0_i32 = arith.constant 0 : i32
    %c0_i32_0 = arith.constant 0 : i32
    %c0_i32_1 = arith.constant 0 : i32
    return %c0_i32, %c0_i32_0 : i32, i32
  }
  func.func @transform_13(%arg0: i32, %arg1: i32) -> (i32, i32) {
    %c0_i32 = arith.constant 0 : i32
    %c0_i32_0 = arith.constant 0 : i32
    %c0_i32_1 = arith.constant 0 : i32
    return %c0_i32, %c0_i32_0 : i32, i32
  }
  func.func @transform_14(%arg0: i32, %arg1: i32) -> (i32, i32) {
    %c0_i32 = arith.constant 0 : i32
    %c0_i32_0 = arith.constant 0 : i32
    %c0_i32_1 = arith.constant 0 : i32
    return %c0_i32, %c0_i32_0 : i32, i32
  }
}

</mosaic_0001>

<bundles_post_ra>
// kernel: text_visual_forward.1
= control target key start
LH: loop header
LB: loop body
LE: loop exit
PB: predicated region body
PF: predicated region fallthrough
CT: control target
= control target key end

     0   :  { %s3841_s0 = inlined_call_operand.vmem [shape: f32[32,128], index: 0, kind: input, shape index: {}]   ;;  %s3842_s1 = inlined_call_operand.vmem [shape: f32[32,1], index: 1, kind: input, shape index: {}]   ;;  %s3843_s2 = inlined_call_operand.vmem [shape: f32[128,128], index: 2, kind: input, shape index: {}]   ;;  %s3844_s3 = inlined_call_operand.vmem [shape: f32[1,128], index: 3, kind: input, shape index: {}]   ;;  %s3845_s4 = inlined_call_operand.vmem [shape: f32[512,16], index: 4, kind: input, shape index: {}]   ;;  %s3846_s5 = inlined_call_operand.vmem [shape: f32[16,128], index: 5, kind: input, shape index: {}]   ;;  %s3847_s6 = inlined_call_operand.vmem [shape: f32[1,128], index: 6, kind: input, shape index: {}]   ;;  %s3848_s7 = inlined_call_operand.vmem [shape: f32[128,128], index: 7, kind: input, shape index: {}]   ;;  %s3849_s8 = inlined_call_operand.vmem [shape: f32[1,128], index: 8, kind: input, shape index: {}]   ;;  %s3850_s9 = inlined_call_operand.vmem [shape: f32[512,128], index: 9, kind: input, shape index: {}]   ;;  %s3851_s10 = inlined_call_operand.vmem [shape: bf16[32,512], index: 10, kind: output, shape index: {0}]   ;;  %s3852_s11 = inlined_call_operand.hbm [shape: f32[2,2], index: 11, kind: output, shape index: {1}]   ;;  %s3853_s12 = inlined_call_operand.hbm [shape: f32[1,1], index: 12, kind: output, shape index: {2}]   ;;  %s3854_s13 = inlined_call_operand.hbm [shape: f32[1,1], index: 13, kind: output, shape index: {3}]   ;;  %s3855_s14 = inlined_call_operand.hbm [shape: f32[1,1], index: 14, kind: output, shape index: {4}]  }
   0x1   :  { %3863 = sst [smem:[#allocation23_spill]] %s3854_s13 }
   0x2   :  { %3864 = sst [smem:[#allocation24_spill]] %s3855_s14 }
   0x3   :  { %20 = vsyncpa [#allocation8], 0 }
   0x4   :  { %21 = vsyncpa [#allocation10], 0 }
   0x5   :  { %22 = vsyncpa [#allocation13], 0  ;;  %s2903_s29 = smov 0   ;;  %s2905_s30 = smov 0  }
   0x6   :  { %s2907_s15 = smov 0   ;;  %s2909_s16 = smov 0  }
   0x7   :  { %s2911_s17 = smov 0   ;;  %s2913_s18 = smov 0  }
   0x8   :  { %s2915_s19 = smov 0  }
   0x9 LB: > { %3865 = sst [smem:[#allocation17_spill]] %s2809_s17  ;;  %s37_s20 = sadd.s32 1, %s2809_s17  ;;  %s2817_s19 = sphi %s2915_s19, %s28_s19   ;;  %s2813_s18 = sphi %s2913_s18, %s3880_s18   ;;  %s2809_s17 = sphi %s2911_s17, %s3879_s17   ;;  %s2805_s16 = sphi %s2909_s16, %s3878_s16   ;;  %s2801_s15 = sphi %s2907_s15, %s3877_s15   ;;  %s2797_s30 = sphi %s2905_s30, %s3882_s30   ;;  %s2793_s29 = sphi %s2903_s29, %s3881_s29  }
   0xa   : > { %3866 = sst [smem:[#allocation18_spill]] %s2813_s18  ;;  %p38_p0 = scmp.ge.s32.totalorder %s37_s20, 2 }
   0xb   : > { %3867 = sst [smem:[#allocation19_spill]] %s2817_s19  ;;  %s40_s21 = sadd.s32 1, %s2813_s18 }
   0xc   : > { %s2167_s22 = sadd.s32 4294967295, %s2817_s19   ;;  %p279_p1 = scmp.ne.s32.totalorder %s2797_s30, %s2793_s29 }
   0xd   : > { %s3884_s20 = smov (%p38_p0, %s37_s20), 0  ;;  %s3886_s21 = smov (!%p38_p0, %s40_s21), %s2813_s18 }
   0xe   : > { %3868 = sst [smem:[#allocation20_spill]] %s3884_s20  ;;  %s265_s23 = ssub.s32 %s2809_s17, %s3884_s20 }
   0xf   : > { %p2948_p2 = scmp.eq.s32.totalorder %s2167_s22, 3  ;;  %p42_p3 = scmp.ge.s32.totalorder %s3886_s21, 2 }
  0x10   : > { %p2171_p4 = scmp.ge.s32.totalorder %s2817_s19, 1  ;;  %p430_p6 = scmp.lt.s32.totalorder %s2817_s19, 5 }
  0x11   : > { %p2955_p5 = por %p2948_p2, %p279_p1  ;;  %s3888_s21 = smov (%p42_p3, %s3886_s21), 0 }
  0x12   : > { %3871 = sst [smem:[#allocation21_spill]] %s3888_s21  ;;  %p431_p7 = pnand %p2171_p4, %p430_p6 }
  0x13   : > { %s264_s26 = ssub.s32 %s2813_s18, %s3888_s21  ;;  %s269_s28 = sadd.s32 1, %s2797_s30 }
  0x14   : > { %s266_s27 = sor.u32 %s265_s23, %s264_s26  ;;  %434 = sbr.rel (%p431_p7) target bundleno = 2554 (0x9fa), region = 60 }
  0x15   : > { %p267_p8 = scmp.eq.s32.totalorder %s266_s27, 0  ;;  %s469_s20 = sand.u32 (!%p431_p7), 1, %s2793_s29  }
  0x16   : > { %s2173_s17 = sshll.u32 (!%p431_p7), %s2805_s16, 1  ;;  %s2172_s14 = sshll.u32 (!%p431_p7), %s469_s20, 4 }
  0x17   : > { %s2966_s22 = scalar_select %p267_p8, %s2797_s30, %s269_s28  }
  0x18   : > { %p481_p9 = scmp.lt.s32.totalorder (!%p431_p7), %s2173_s17, 3  ;;  %p495_p10 = scmp.eq.s32.totalorder (!%p431_p7), %s2805_s16, 0 }
  0x19   : > { %3872 = sst [smem:[#allocation22_spill]] %s2966_s22  ;;  %p496_p11 = scmp.eq.s32.totalorder (!%p431_p7), %s2801_s15, 0 }
  0x1a   : > { %s2982_s18 = scalar_lea.vmem (!%p431_p7), [#allocation6], %s2172_s14 }
  0x1b   : > { %s3890_s17 = smov (!%p481_p9, %s2173_s17), 3  ;;  %p497_p12 = pnand %p496_p11, %p495_p10 }
  0x1c   : > { %s2174_s19 = sshll.u32 %s3890_s17, 3  ;;  %v597_v0 = vld [vmem:[%s3846_s5] sm:$0xff] (!%p497_p12)  ;;  %v598_v1 = vld [vmem:[%s3846_s5 + $0x8] sm:$0xff] (!%p497_p12)  ;;  %vm607_vm0 = vcmask (!%p497_p12), 130048   ;;  %v503_v5 = vld [vmem:[%s3845_s4 + $0x10] sm:$0xff] (!%p497_p12)  ;;  %vm1537_vm1 = vcmask (!%p497_p12), 9216  }
  0x1d   : > { %s2975_s23 = scalar_lea.vmem %s3841_s0, %s2174_s19  ;;  %s2980_s28 = scalar_lea.vmem %s3842_s1, %s2174_s19  ;;  %v501_v2 = vld [vmem:[%s3845_s4] sm:$0xff] (!%p497_p12)  ;;  %v599_v3 = vpack.c.bf16 (!%p497_p12), %v598_v1, %v597_v0  ;;  %v502_v4 = vld [vmem:[%s3845_s4 + $0x8] sm:$0xff] (!%p497_p12)  ;;  %v504_v6 = vld [vmem:[%s3845_s4 + $0x18] sm:$0xff] (!%p497_p12)  ;;  %vm1539_vm2 = vcmask (!%p497_p12), 0  }
  0x1e   : > { %500 = sbr.rel (%p497_p12) target bundleno = 597 (0x255), region = 64  ;;  %v565_v7 = vpack.c.bf16 (!%p497_p12), %v502_v4, %v501_v2  ;;  %v505_v8 = vld [vmem:[%s3845_s4 + $0x20] sm:$0xff] (!%p497_p12)  ;;  %v506_v9 = vld [vmem:[%s3845_s4 + $0x28] sm:$0xff] (!%p497_p12)  ;;  %v566_v10 = vpack.c.bf16 (!%p497_p12), %v504_v6, %v503_v5  ;;  %v507_v12 = vld [vmem:[%s3845_s4 + $0x30] sm:$0xff] (!%p497_p12) }
  0x1f   : > { %2342 = vmatprep.subr.bf16.mxu0 (!%p497_p12), %v599_v3  ;;  %v567_v11 = vpack.c.bf16 (!%p497_p12), %v506_v9, %v505_v8  ;;  %v508_v13 = vld [vmem:[%s3845_s4 + $0x38] sm:$0xff] (!%p497_p12)  ;;  %v509_v14 = vld [vmem:[%s3845_s4 + $0x40] sm:$0xff] (!%p497_p12)  ;;  %v510_v15 = vld [vmem:[%s3845_s4 + $0x48] sm:$0xff] (!%p497_p12) }
  0x20   : > { %2343 = vmatpush3.bf16.msra.mxu0 (!%p497_p12), %v599_v3  ;;  %2344 = vmatprep.mubr.msk.bf16.mxu0 (!%p497_p12), %vm607_vm0, %v565_v7  ;;  %v568_v16 = vpack.c.bf16 (!%p497_p12), %v508_v13, %v507_v12  ;;  %v569_v17 = vpack.c.bf16 (!%p497_p12), %v510_v15, %v509_v14  ;;  %v511_v18 = vld [vmem:[%s3845_s4 + $0x50] sm:$0xff] (!%p497_p12)  ;;  %v512_v19 = vld [vmem:[%s3845_s4 + $0x58] sm:$0xff] (!%p497_p12)  ;;  %v513_v20 = vld [vmem:[%s3845_s4 + $0x60] sm:$0xff] (!%p497_p12) }
  0x21   : > { %v514_v21 = vld [vmem:[%s3845_s4 + $0x68] sm:$0xff] (!%p497_p12)  ;;  %v570_v22 = vpack.c.bf16 (!%p497_p12), %v512_v19, %v511_v18  ;;  %v1025_v24 = vld [vmem:[%s3848_s7] sm:$0xff] (!%p497_p12)  ;;  %v1027_v26 = vld [vmem:[%s3848_s7 + $0x10] sm:$0xff] (!%p497_p12) }
  0x22   : > { %v571_v23 = vpack.c.bf16 (!%p497_p12), %v514_v21, %v513_v20  ;;  %v1026_v25 = vld [vmem:[%s3848_s7 + $0x8] sm:$0xff] (!%p497_p12)  ;;  %v515_v27 = vld [vmem:[%s3845_s4 + $0x70] sm:$0xff] (!%p497_p12)  ;;  %v1028_v29 = vld [vmem:[%s3848_s7 + $0x18] sm:$0xff] (!%p497_p12) }
  0x23   : > { %2345 = vmatmul.mubr.msk.bf16.vlgmr.msra.gmra.mrb[0].mxu0 (!%p497_p12), %vm607_vm0, %v566_v10  ;;  %v1041_v28 = vpack.c.bf16 (!%p497_p12), %v1026_v25, %v1025_v24  ;;  %v516_v30 = vld [vmem:[%s3845_s4 + $0x78] sm:$0xff] (!%p497_p12)  ;;  %v1042_v31 = vpack.c.bf16 (!%p497_p12), %v1028_v29, %v1027_v26  ;;  %v1029_v32 = vld [vmem:[%s3848_s7 + $0x20] sm:$0xff] (!%p497_p12)  ;;  %v1030_v33 = vld [vmem:[%s3848_s7 + $0x28] sm:$0xff] (!%p497_p12) }
  0x24   : > { %2348 = vmatprep.mubr.msk.bf16.mxu0 (!%p497_p12), %vm607_vm0, %v567_v11  ;;  %v517_v34 = vld [vmem:[%s3845_s4 + $0x80] sm:$0xff] (!%p497_p12)  ;;  %v518_v35 = vld [vmem:[%s3845_s4 + $0x88] sm:$0xff] (!%p497_p12)  ;;  %v572_v36 = vpack.c.bf16 (!%p497_p12), %v516_v30, %v515_v27  ;;  %v1043_v37 = vpack.c.bf16 (!%p497_p12), %v1030_v33, %v1029_v32  ;;  %v1031_v39 = vld [vmem:[%s3848_s7 + $0x30] sm:$0xff] (!%p497_p12) }
  0x25   : > { %2408 = vmatprep.subr.bf16.mxu0 %v1041_v28  ;;  %2508 = vmatprep.subr.bf16.mxu1 %v1041_v28  ;;  %v573_v38 = vpack.c.bf16 %v518_v35, %v517_v34  ;;  %v1032_v40 = vld [vmem:[%s3848_s7 + $0x38] sm:$0xff]  ;;  %v519_v41 = vld [vmem:[%s3845_s4 + $0x90] sm:$0xff]  ;;  %v1033_v44 = vld [vmem:[%s3848_s7 + $0x40] sm:$0xff] }
  0x26   : > { %2409 = vmatpush3.bf16.msra.mxu0 %v1041_v28  ;;  %2516 = vmatpush3.bf16.msra.mxu1 %v1041_v28  ;;  %v1044_v42 = vpack.c.bf16 %v1032_v40, %v1031_v39  ;;  %v520_v43 = vld [vmem:[%s3845_s4 + $0x98] sm:$0xff]  ;;  %v1034_v45 = vld [vmem:[%s3848_s7 + $0x48] sm:$0xff]  ;;  %v521_v46 = vld [vmem:[%s3845_s4 + $0xa0] sm:$0xff] }
  0x27   : > { %2410 = vmatprep.subr.bf16.mxu0 %v1042_v31  ;;  %2509 = vmatprep.subr.bf16.mxu1 %v1042_v31  ;;  %v522_v47 = vld [vmem:[%s3845_s4 + $0xa8] sm:$0xff]  ;;  %v574_v48 = vpack.c.bf16 %v520_v43, %v519_v41  ;;  %v1045_v49 = vpack.c.bf16 %v1034_v45, %v1033_v44  ;;  %v1035_v51 = vld [vmem:[%s3848_s7 + $0x50] sm:$0xff]  ;;  %v1036_v52 = vld [vmem:[%s3848_s7 + $0x58] sm:$0xff] }
  0x28   : > { %v575_v50 = vpack.c.bf16 %v522_v47, %v521_v46  ;;  %v1046_v53 = vpack.c.bf16 %v1036_v52, %v1035_v51  ;;  %v523_v54 = vld [vmem:[%s3845_s4 + $0xb0] sm:$0xff]  ;;  %v524_v55 = vld [vmem:[%s3845_s4 + $0xb8] sm:$0xff]  ;;  %v525_v56 = vld [vmem:[%s3845_s4 + $0xc0] sm:$0xff] }
  0x29   : > { %v526_v57 = vld [vmem:[%s3845_s4 + $0xc8] sm:$0xff]  ;;  %v576_v58 = vpack.c.bf16 %v524_v55, %v523_v54  ;;  %v527_v60 = vld [vmem:[%s3845_s4 + $0xd0] sm:$0xff]  ;;  %v528_v61 = vld [vmem:[%s3845_s4 + $0xd8] sm:$0xff] }
  0x2a   : > { %2411 = vmatpush3.bf16.msra.mxu0 %v1042_v31  ;;  %2517 = vmatpush3.bf16.msra.mxu1 %v1042_v31  ;;  %v577_v59 = vpack.c.bf16 %v526_v57, %v525_v56  ;;  %v529_v62 = vld [vmem:[%s3845_s4 + $0xe0] sm:$0xff]  ;;  %v530_v63 = vld [vmem:[%s3845_s4 + $0xe8] sm:$0xff]  ;;  %v578_v0 = vpack.c.bf16 %v528_v61, %v527_v60  ;;  %v531_v2 = vld [vmem:[%s3845_s4 + $0xf0] sm:$0xff] }
  0x2b   : > { %2349 = vmatmul.mubr.msk.bf16.gmra.mrb[4].mxu0 %vm607_vm0, %v568_v16  ;;  %2412 = vmatprep.subr.bf16.mxu0 %v1043_v37  ;;  %v579_v1 = vpack.c.bf16 %v530_v63, %v529_v62  ;;  %v532_v3 = vld [vmem:[%s3845_s4 + $0xf8] sm:$0xff]  ;;  %v533_v4 = vld [vmem:[%s3845_s4 + $0x100] sm:$0xff]  ;;  %v534_v5 = vld [vmem:[%s3845_s4 + $0x108] sm:$0xff] }
  0x2c   : > { %2352 = vmatprep.mubr.msk.bf16.mxu0 %vm607_vm0, %v569_v17  ;;  %2510 = vmatprep.subr.bf16.mxu1 %v1043_v37  ;;  %v580_v6 = vpack.c.bf16 %v532_v3, %v531_v2  ;;  %v581_v7 = vpack.c.bf16 %v534_v5, %v533_v4  ;;  %v535_v8 = vld [vmem:[%s3845_s4 + $0x110] sm:$0xff]  ;;  %v536_v9 = vld [vmem:[%s3845_s4 + $0x118] sm:$0xff]  ;;  %v537_v10 = vld [vmem:[%s3845_s4 + $0x120] sm:$0xff] }
  0x2d   : > { %v538_v11 = vld [vmem:[%s3845_s4 + $0x128] sm:$0xff]  ;;  %v582_v12 = vpack.c.bf16 %v536_v9, %v535_v8  ;;  %v539_v14 = vld [vmem:[%s3845_s4 + $0x130] sm:$0xff]  ;;  %v540_v15 = vld [vmem:[%s3845_s4 + $0x138] sm:$0xff] }
  0x2e   : > { %2413 = vmatpush3.bf16.msra.mxu0 %v1043_v37  ;;  %2518 = vmatpush3.bf16.msra.mxu1 %v1043_v37  ;;  %v583_v13 = vpack.c.bf16 %v538_v11, %v537_v10  ;;  %v541_v16 = vld [vmem:[%s3845_s4 + $0x140] sm:$0xff]  ;;  %v542_v17 = vld [vmem:[%s3845_s4 + $0x148] sm:$0xff]  ;;  %v584_v18 = vpack.c.bf16 %v540_v15, %v539_v14  ;;  %v543_v20 = vld [vmem:[%s3845_s4 + $0x150] sm:$0xff] }
  0x2f   : > { %2414 = vmatprep.subr.bf16.mxu0 %v1044_v42  ;;  %2511 = vmatprep.subr.bf16.mxu1 %v1044_v42  ;;  %v585_v19 = vpack.c.bf16 %v542_v17, %v541_v16  ;;  %v544_v21 = vld [vmem:[%s3845_s4 + $0x158] sm:$0xff]  ;;  %v547_v26 = vld [vmem:[%s3845_s4 + $0x170] sm:$0xff]  ;;  %v1037_v28 = vld [vmem:[%s3848_s7 + $0x60] sm:$0xff] }
  0x30   : > { %v586_v24 = vpack.c.bf16 %v544_v21, %v543_v20  ;;  %v548_v27 = vld [vmem:[%s3845_s4 + $0x178] sm:$0xff]  ;;  %v1038_v29 = vld [vmem:[%s3848_s7 + $0x68] sm:$0xff]  ;;  %v549_v30 = vld [vmem:[%s3845_s4 + $0x180] sm:$0xff] }
  0x31   : > { %v550_v31 = vld [vmem:[%s3845_s4 + $0x188] sm:$0xff]  ;;  %v1047_v32 = vpack.c.bf16 %v1038_v29, %v1037_v28  ;;  %v588_v33 = vpack.c.bf16 %v548_v27, %v547_v26  ;;  %v1039_v35 = vld [vmem:[%s3848_s7 + $0x70] sm:$0xff]  ;;  %v552_v39 = vld [vmem:[%s3845_s4 + $0x198] sm:$0xff] }
  0x32   : > { %2415 = vmatpush3.bf16.msra.mxu0 %v1044_v42  ;;  %2519 = vmatpush3.bf16.msra.mxu1 %v1044_v42  ;;  %v589_v34 = vpack.c.bf16 %v550_v31, %v549_v30  ;;  %v553_v40 = vld [vmem:[%s3845_s4 + $0x1a0] sm:$0xff]  ;;  %v554_v41 = vld [vmem:[%s3845_s4 + $0x1a8] sm:$0xff]  ;;  %v555_v44 = vld [vmem:[%s3845_s4 + $0x1b0] sm:$0xff] }
  0x33   : > { %2353 = vmatmul.mubr.msk.bf16.gmra.mrb[8].mxu0 %vm607_vm0, %v570_v22  ;;  %2416 = vmatprep.subr.bf16.mxu0 %v1045_v49  ;;  %v545_v22 = vld [vmem:[%s3845_s4 + $0x160] sm:$0xff]  ;;  %v591_v43 = vpack.c.bf16 %v554_v41, %v553_v40  ;;  %v556_v45 = vld [vmem:[%s3845_s4 + $0x1b8] sm:$0xff]  ;;  %v558_v47 = vld [vmem:[%s3845_s4 + $0x1c8] sm:$0xff] }
  0x34   : > { %2356 = vmatprep.mubr.msk.bf16.mxu0 %vm607_vm0, %v571_v23  ;;  %2512 = vmatprep.subr.bf16.mxu1 %v1045_v49  ;;  %v546_v23 = vld [vmem:[%s3845_s4 + $0x168] sm:$0xff]  ;;  %v557_v46 = vld [vmem:[%s3845_s4 + $0x1c0] sm:$0xff]  ;;  %v560_v51 = vld [vmem:[%s3845_s4 + $0x1d8] sm:$0xff] }
  0x35   : > { %v587_v25 = vpack.c.bf16 %v546_v23, %v545_v22  ;;  %v561_v52 = vld [vmem:[%s3845_s4 + $0x1e0] sm:$0xff]  ;;  %v563_v56 = vld [vmem:[%s3845_s4 + $0x1f0] sm:$0xff]  ;;  %v564_v57 = vld [vmem:[%s3845_s4 + $0x1f8] sm:$0xff] }
  0x36   : > { %2417 = vmatpush3.bf16.msra.mxu0 %v1045_v49  ;;  %2520 = vmatpush3.bf16.msra.mxu1 %v1045_v49  ;;  %v593_v49 = vpack.c.bf16 %v558_v47, %v557_v46  ;;  %v3265_v60 = vld [vmem:[%s3847_s6] ss:$0 sm:$0xff] }
  0x37   : > { %2418 = vmatprep.subr.bf16.mxu0 %v1046_v53  ;;  %2513 = vmatprep.subr.bf16.mxu1 %v1046_v53 }
  0x3a   : > { %2419 = vmatpush3.bf16.msra.mxu0 %v1046_v53  ;;  %2521 = vmatpush3.bf16.msra.mxu1 %v1046_v53  ;;  %v562_v53 = vld [vmem:[%s3845_s4 + $0x1e8] sm:$0xff] }
  0x3b   : > { %2357 = vmatmul.mubr.msk.bf16.gmra.mrb[12].mxu0 %vm607_vm0, %v572_v36  ;;  %2420 = vmatprep.subr.bf16.mxu0 %v1047_v32  ;;  %v1040_v36 = vld [vmem:[%s3848_s7 + $0x78] sm:$0xff]  ;;  %v595_v55 = vpack.c.bf16 %v562_v53, %v561_v52 }
  0x3c   : > { %2360 = vmatprep.mubr.msk.bf16.mxu0 %vm607_vm0, %v573_v38  ;;  %2514 = vmatprep.subr.bf16.mxu1 %v1047_v32  ;;  %v1048_v37 = vpack.c.bf16 %v1040_v36, %v1039_v35  ;;  %v551_v38 = vld [vmem:[%s3845_s4 + $0x190] sm:$0xff] }
  0x3d   : > { %v590_v42 = vpack.c.bf16 %v552_v39, %v551_v38 }
  0x3e   : > { %2421 = vmatpush3.bf16.msra.mxu0 %v1047_v32  ;;  %2522 = vmatpush3.bf16.msra.mxu1 %v1047_v32 }
  0x3f   : > { %2422 = vmatprep.subr.bf16.mxu0 %v1048_v37  ;;  %2515 = vmatprep.subr.bf16.mxu1 %v1048_v37 }
  0x42   : > { %2423 = vmatpush3.bf16.msra.mxu0 %v1048_v37  ;;  %2523 = vmatpush3.bf16.msra.mxu1 %v1048_v37 }
  0x43   : > { %2361 = vmatmul.mubr.msk.bf16.gmra.mrb[16].mxu0 %vm607_vm0, %v574_v48  ;;  %v592_v48 = vpack.c.bf16 %v556_v45, %v555_v44 }
  0x44   : > { %2364 = vmatprep.mubr.msk.bf16.mxu0 %vm607_vm0, %v575_v50  ;;  %v559_v50 = vld [vmem:[%s3845_s4 + $0x1d0] sm:$0xff] }
  0x45   : > { %v594_v54 = vpack.c.bf16 %v560_v51, %v559_v50 }
  0x4b   : > { %2365 = vmatmul.mubr.msk.bf16.gmra.mrb[20].mxu0 %vm607_vm0, %v576_v58  ;;  %v596_v58 = vpack.c.bf16 %v564_v57, %v563_v56 }
  0x4c   : > { %2368 = vmatprep.mubr.msk.bf16.mxu0 %vm607_vm0, %v577_v59 }
  0x53   : > { %2369 = vmatmul.mubr.msk.bf16.gmra.mrb[24].mxu0 %vm607_vm0, %v578_v0 }
  0x54   : > { %2372 = vmatprep.mubr.msk.bf16.mxu0 %vm607_vm0, %v579_v1 }
  0x5b   : > { %2373 = vmatmul.mubr.msk.bf16.gmra.mrb[28].mxu0 %vm607_vm0, %v580_v6 }
  0x5c   : > { %2376 = vmatprep.mubr.msk.bf16.mxu0 %vm607_vm0, %v581_v7 }
  0x63   : > { %2377 = vmatmul.mubr.msk.bf16.gmra.mrb[32].mxu0 %vm607_vm0, %v582_v12 }
  0x64   : > { %2380 = vmatprep.mubr.msk.bf16.mxu0 %vm607_vm0, %v583_v13 }
  0x6b   : > { %2381 = vmatmul.mubr.msk.bf16.gmra.mrb[36].mxu0 %vm607_vm0, %v584_v18 }
  0x6c   : > { %2384 = vmatprep.mubr.msk.bf16.mxu0 %vm607_vm0, %v585_v19 }
  0x73   : > { %2385 = vmatmul.mubr.msk.bf16.gmra.mrb[40].mxu0 %vm607_vm0, %v586_v24 }
  0x74   : > { %2388 = vmatprep.mubr.msk.bf16.mxu0 %vm607_vm0, %v587_v25 }
  0x7b   : > { %2389 = vmatmul.mubr.msk.bf16.gmra.mrb[44].mxu0 %vm607_vm0, %v588_v33 }
  0x7c   : > { %2392 = vmatprep.mubr.msk.bf16.mxu0 %vm607_vm0, %v589_v34 }
  0x83   : > { %2393 = vmatmul.mubr.msk.bf16.gmra.mrb[48].mxu0 %vm607_vm0, %v590_v42 }
  0x84   : > { %2396 = vmatprep.mubr.msk.bf16.mxu0 %vm607_vm0, %v591_v43 }
  0x8b   : > { %2397 = vmatmul.mubr.msk.bf16.gmra.mrb[52].mxu0 %vm607_vm0, %v592_v48 }
  0x8c   : > { %2400 = vmatprep.mubr.msk.bf16.mxu0 %vm607_vm0, %v593_v49 }
  0x93   : > { %2401 = vmatmul.mubr.msk.bf16.gmra.mrb[56].mxu0 %vm607_vm0, %v594_v54 }
  0x94   : > { %2404 = vmatprep.mubr.msk.bf16.mxu0 %vm607_vm0, %v595_v55 }
  0x9b   : > { %2405 = vmatmul.mubr.msk.bf16.gmra.mrb[60].mxu0 %vm607_vm0, %v596_v58 }
  0xf6   : > { %v2346_v59 = vpop.f32.mrb[0].mxu0 }
  0xf7   : > { %v738_v61 = vpop.f32.mrb[1].mxu0  ;;  %v747_v63 = vadd.f32 %v2346_v59, %v3265_v60 }
  0xf8   : > { %v2347_v62 = vpop.f32.mrb[2].mxu0  ;;  %v739_v2 = vadd.f32 %v3265_v60, %v738_v61 }
  0xf9   : > { %v750_v0 = vadd.f32 %v2347_v62, %v3265_v60  ;;  %v741_v1 = vpop.f32.mrb[3].mxu0 }
  0xfa   : > { %v742_v3 = vadd.f32 %v3265_v60, %v741_v1 }
  0xfb   : > { %v994_v4 = vpack.c.bf16 %v750_v0, %v747_v63 }
  0xfc   : > { %v993_v5 = vpack.c.bf16 %v742_v3, %v739_v2 }
  0xfe   : > { %v2350_v6 = vpop.f32.mrb[4].mxu0  ;;  %2424 = vmatprep.mubr.bf16.mxu0 %v993_v5 }
  0xff   : > { %v754_v7 = vpop.f32.mrb[5].mxu0  ;;  %2425 = vmatmul.mubr.bf16.vlgmr.msra.gmra.mrb[64].mxu0 %v994_v4  ;;  %v763_v9 = vadd.f32 %v2350_v6, %v3265_v60 }
 0x100   : > { %v2351_v8 = vpop.f32.mrb[6].mxu0  ;;  %v755_v12 = vadd.f32 %v3265_v60, %v754_v7 }
 0x101   : > { %v766_v10 = vadd.f32 %v2351_v8, %v3265_v60  ;;  %v757_v11 = vpop.f32.mrb[7].mxu0 }
 0x102   : > { %v758_v13 = vadd.f32 %v3265_v60, %v757_v11 }
 0x103   : > { %v996_v14 = vpack.c.bf16 %v766_v10, %v763_v9 }
 0x104   : > { %v995_v15 = vpack.c.bf16 %v758_v13, %v755_v12 }
 0x106   : > { %v2354_v16 = vpop.f32.mrb[8].mxu0  ;;  %2428 = vmatprep.mubr.bf16.mxu1 %v995_v15 }
 0x107   : > { %v770_v17 = vpop.f32.mrb[9].mxu0  ;;  %2429 = vmatmul.mubr.bf16.vlgmr.msra.gmra.mrb[0].mxu1 %v996_v14  ;;  %v779_v19 = vadd.f32 %v2354_v16, %v3265_v60 }
 0x108   : > { %v2355_v18 = vpop.f32.mrb[10].mxu0  ;;  %v771_v22 = vadd.f32 %v3265_v60, %v770_v17 }
 0x109   : > { %v782_v20 = vadd.f32 %v2355_v18, %v3265_v60  ;;  %v773_v21 = vpop.f32.mrb[11].mxu0 }
 0x10a   : > { %v774_v23 = vadd.f32 %v3265_v60, %v773_v21 }
 0x10b   : > { %v998_v24 = vpack.c.bf16 %v782_v20, %v779_v19 }
 0x10c   : > { %v997_v25 = vpack.c.bf16 %v774_v23, %v771_v22 }
 0x10e   : > { %v2358_v26 = vpop.f32.mrb[12].mxu0  ;;  %2432 = vmatprep.mubr.bf16.mxu1 %v997_v25 }
 0x10f   : > { %v786_v27 = vpop.f32.mrb[13].mxu0  ;;  %2433 = vmatmul.mubr.bf16.gmra.mrb[4].mxu1 %v998_v24  ;;  %v795_v29 = vadd.f32 %v2358_v26, %v3265_v60 }
 0x110   : > { %v2359_v28 = vpop.f32.mrb[14].mxu0  ;;  %v787_v32 = vadd.f32 %v3265_v60, %v786_v27 }
 0x111   : > { %v798_v30 = vadd.f32 %v2359_v28, %v3265_v60  ;;  %v789_v31 = vpop.f32.mrb[15].mxu0 }
 0x112   : > { %v790_v33 = vadd.f32 %v3265_v60, %v789_v31 }
 0x113   : > { %v1000_v34 = vpack.c.bf16 %v798_v30, %v795_v29 }
 0x114   : > { %v999_v35 = vpack.c.bf16 %v790_v33, %v787_v32 }
 0x116   : > { %v2362_v36 = vpop.f32.mrb[16].mxu0  ;;  %2436 = vmatprep.mubr.bf16.mxu1 %v999_v35 }
 0x117   : > { %v802_v37 = vpop.f32.mrb[17].mxu0  ;;  %2437 = vmatmul.mubr.bf16.gmra.mrb[8].mxu1 %v1000_v34  ;;  %v811_v39 = vadd.f32 %v2362_v36, %v3265_v60 }
 0x118   : > { %v2363_v38 = vpop.f32.mrb[18].mxu0  ;;  %v803_v42 = vadd.f32 %v3265_v60, %v802_v37 }
 0x119   : > { %v814_v40 = vadd.f32 %v2363_v38, %v3265_v60  ;;  %v805_v41 = vpop.f32.mrb[19].mxu0 }
 0x11a   : > { %v806_v43 = vadd.f32 %v3265_v60, %v805_v41 }
 0x11b   : > { %v1002_v44 = vpack.c.bf16 %v814_v40, %v811_v39 }
 0x11c   : > { %v1001_v45 = vpack.c.bf16 %v806_v43, %v803_v42 }
 0x11e   : > { %v2366_v46 = vpop.f32.mrb[20].mxu0  ;;  %2440 = vmatprep.mubr.bf16.mxu1 %v1001_v45 }
 0x11f   : > { %v818_v47 = vpop.f32.mrb[21].mxu0  ;;  %2441 = vmatmul.mubr.bf16.gmra.mrb[12].mxu1 %v1002_v44  ;;  %v827_v49 = vadd.f32 %v2366_v46, %v3265_v60 }
 0x120   : > { %v2367_v48 = vpop.f32.mrb[22].mxu0  ;;  %v819_v52 = vadd.f32 %v3265_v60, %v818_v47 }
 0x121   : > { %v830_v50 = vadd.f32 %v2367_v48, %v3265_v60  ;;  %v821_v51 = vpop.f32.mrb[23].mxu0 }
 0x122   : > { %v822_v53 = vadd.f32 %v3265_v60, %v821_v51 }
 0x123   : > { %v1004_v54 = vpack.c.bf16 %v830_v50, %v827_v49 }
 0x124   : > { %v1003_v55 = vpack.c.bf16 %v822_v53, %v819_v52 }
 0x126   : > { %v2370_v56 = vpop.f32.mrb[24].mxu0  ;;  %2444 = vmatprep.mubr.bf16.mxu1 %v1003_v55 }
 0x127   : > { %v834_v57 = vpop.f32.mrb[25].mxu0  ;;  %2445 = vmatmul.mubr.bf16.gmra.mrb[16].mxu1 %v1004_v54  ;;  %v843_v59 = vadd.f32 %v2370_v56, %v3265_v60 }
 0x128   : > { %v2371_v58 = vpop.f32.mrb[26].mxu0  ;;  %v835_v63 = vadd.f32 %v3265_v60, %v834_v57 }
 0x129   : > { %v846_v61 = vadd.f32 %v2371_v58, %v3265_v60  ;;  %v837_v62 = vpop.f32.mrb[27].mxu0 }
 0x12a   : > { %v838_v0 = vadd.f32 %v3265_v60, %v837_v62 }
 0x12b   : > { %v1006_v1 = vpack.c.bf16 %v846_v61, %v843_v59 }
 0x12c   : > { %v1005_v2 = vpack.c.bf16 %v838_v0, %v835_v63 }
 0x12e   : > { %v2374_v3 = vpop.f32.mrb[28].mxu0  ;;  %2448 = vmatprep.mubr.bf16.mxu1 %v1005_v2 }
 0x12f   : > { %v850_v4 = vpop.f32.mrb[29].mxu0  ;;  %2449 = vmatmul.mubr.bf16.gmra.mrb[20].mxu1 %v1006_v1  ;;  %v859_v6 = vadd.f32 %v2374_v3, %v3265_v60 }
 0x130   : > { %v2375_v5 = vpop.f32.mrb[30].mxu0  ;;  %v851_v9 = vadd.f32 %v3265_v60, %v850_v4 }
 0x131   : > { %v862_v7 = vadd.f32 %v2375_v5, %v3265_v60  ;;  %v853_v8 = vpop.f32.mrb[31].mxu0 }
 0x132   : > { %v854_v10 = vadd.f32 %v3265_v60, %v853_v8 }
 0x133   : > { %v1008_v11 = vpack.c.bf16 %v862_v7, %v859_v6 }
 0x134   : > { %v1007_v12 = vpack.c.bf16 %v854_v10, %v851_v9 }
 0x136   : > { %v2378_v13 = vpop.f32.mrb[32].mxu0  ;;  %2452 = vmatprep.mubr.bf16.mxu1 %v1007_v12 }
 0x137   : > { %v866_v14 = vpop.f32.mrb[33].mxu0  ;;  %2453 = vmatmul.mubr.bf16.gmra.mrb[24].mxu1 %v1008_v11  ;;  %v875_v16 = vadd.f32 %v2378_v13, %v3265_v60 }
 0x138   : > { %v2379_v15 = vpop.f32.mrb[34].mxu0  ;;  %v867_v19 = vadd.f32 %v3265_v60, %v866_v14 }
 0x139   : > { %v878_v17 = vadd.f32 %v2379_v15, %v3265_v60  ;;  %v869_v18 = vpop.f32.mrb[35].mxu0 }
 0x13a   : > { %v870_v20 = vadd.f32 %v3265_v60, %v869_v18 }
 0x13b   : > { %v1010_v21 = vpack.c.bf16 %v878_v17, %v875_v16 }
 0x13c   : > { %v1009_v22 = vpack.c.bf16 %v870_v20, %v867_v19 }
 0x13e   : > { %v2382_v23 = vpop.f32.mrb[36].mxu0  ;;  %2456 = vmatprep.mubr.bf16.mxu1 %v1009_v22 }
 0x13f   : > { %v882_v24 = vpop.f32.mrb[37].mxu0  ;;  %2457 = vmatmul.mubr.bf16.gmra.mrb[28].mxu1 %v1010_v21  ;;  %v891_v26 = vadd.f32 %v2382_v23, %v3265_v60 }
 0x140   : > { %v2383_v25 = vpop.f32.mrb[38].mxu0  ;;  %v883_v29 = vadd.f32 %v3265_v60, %v882_v24 }
 0x141   : > { %v894_v27 = vadd.f32 %v2383_v25, %v3265_v60  ;;  %v885_v28 = vpop.f32.mrb[39].mxu0 }
 0x142   : > { %v886_v30 = vadd.f32 %v3265_v60, %v885_v28 }
 0x143   : > { %v1012_v31 = vpack.c.bf16 %v894_v27, %v891_v26 }
 0x144   : > { %v1011_v32 = vpack.c.bf16 %v886_v30, %v883_v29  ;;  %v3334_v30 = vld [vmem:[%s3849_s8] ss:$0 sm:$0xff] }
 0x146   : > { %v2386_v33 = vpop.f32.mrb[40].mxu0  ;;  %2460 = vmatprep.mubr.bf16.mxu1 %v1011_v32 }
 0x147   : > { %v898_v34 = vpop.f32.mrb[41].mxu0  ;;  %2461 = vmatmul.mubr.bf16.gmra.mrb[32].mxu1 %v1012_v31  ;;  %v907_v36 = vadd.f32 %v2386_v33, %v3265_v60 }
 0x148   : > { %v2387_v35 = vpop.f32.mrb[42].mxu0  ;;  %v899_v39 = vadd.f32 %v3265_v60, %v898_v34  ;;  %v1347_v34 = vld [vmem:[%s3850_s9 + $0x10] sm:$0xff] }
 0x149   : > { %v910_v37 = vadd.f32 %v2387_v35, %v3265_v60  ;;  %v901_v38 = vpop.f32.mrb[43].mxu0 }
 0x14a   : > { %v902_v40 = vadd.f32 %v3265_v60, %v901_v38  ;;  %v1345_v38 = vld [vmem:[%s3850_s9] sm:$0xff] }
 0x14b   : > { %v1014_v41 = vpack.c.bf16 %v910_v37, %v907_v36  ;;  %v1348_v36 = vld [vmem:[%s3850_s9 + $0x18] sm:$0xff]  ;;  %v2819_v37 = vmov 0.0  }
 0x14c   : > { %v1013_v42 = vpack.c.bf16 %v902_v40, %v899_v39  ;;  %1538 = vst.msk [vmem:[#allocation7] sm:$0x3] %vm1537_vm1, %v2819_v37 }
 0x14d   : > { %1540 = vst.msk [vmem:[#allocation9] sm:$0x1] %vm1539_vm2, %v2819_v37  ;;  %1541 = vst.msk [vmem:[#allocation11] sm:$0x1] %vm1539_vm2, %v2819_v37 }
 0x14e   : > { %v2390_v43 = vpop.f32.mrb[44].mxu0  ;;  %2464 = vmatprep.mubr.bf16.mxu1 %v1013_v42  ;;  %1542 = vst.msk [vmem:[#allocation12] sm:$0x1] %vm1539_vm2, %v2819_v37  ;;  %1543 = vst.msk [vmem:[#allocation4] sm:$0x1] %vm1539_vm2, %v2819_v37 }
 0x14f   : > { %v914_v44 = vpop.f32.mrb[45].mxu0  ;;  %2465 = vmatmul.mubr.bf16.gmra.mrb[36].mxu1 %v1014_v41  ;;  %v923_v46 = vadd.f32 %v2390_v43, %v3265_v60  ;;  %1544 = vst.msk [vmem:[#allocation5] sm:$0x1] %vm1539_vm2, %v2819_v37  ;;  %v1346_v41 = vld [vmem:[%s3850_s9 + $0x8] sm:$0xff] }
 0x150   : > { %v2391_v45 = vpop.f32.mrb[46].mxu0  ;;  %v915_v49 = vadd.f32 %v3265_v60, %v914_v44 }
 0x151   : > { %v926_v47 = vadd.f32 %v2391_v45, %v3265_v60  ;;  %v917_v48 = vpop.f32.mrb[47].mxu0 }
 0x152   : > { %v918_v50 = vadd.f32 %v3265_v60, %v917_v48 }
 0x153   : > { %v1016_v51 = vpack.c.bf16 %v926_v47, %v923_v46 }
 0x154   : > { %v1015_v52 = vpack.c.bf16 %v918_v50, %v915_v49 }
 0x156   : > { %v2394_v53 = vpop.f32.mrb[48].mxu0  ;;  %2468 = vmatprep.mubr.bf16.mxu1 %v1015_v52  ;;  %v1351_v52 = vld [vmem:[%s3850_s9 + $0x30] sm:$0xff] }
 0x157   : > { %v930_v54 = vpop.f32.mrb[49].mxu0  ;;  %2469 = vmatmul.mubr.bf16.gmra.mrb[40].mxu1 %v1016_v51  ;;  %v939_v56 = vadd.f32 %v2394_v53, %v3265_v60 }
 0x158   : > { %v2395_v55 = vpop.f32.mrb[50].mxu0  ;;  %v931_v59 = vadd.f32 %v3265_v60, %v930_v54 }
 0x159   : > { %v942_v57 = vadd.f32 %v2395_v55, %v3265_v60  ;;  %v933_v58 = vpop.f32.mrb[51].mxu0  ;;  %v1352_v55 = vld [vmem:[%s3850_s9 + $0x38] sm:$0xff] }
 0x15a   : > { %v934_v61 = vadd.f32 %v3265_v60, %v933_v58 }
 0x15b   : > { %v1018_v62 = vpack.c.bf16 %v942_v57, %v939_v56  ;;  %v1349_v56 = vld [vmem:[%s3850_s9 + $0x20] sm:$0xff] }
 0x15c   : > { %v1017_v63 = vpack.c.bf16 %v934_v61, %v931_v59  ;;  %v1350_v59 = vld [vmem:[%s3850_s9 + $0x28] sm:$0xff] }
 0x15e   : > { %v2398_v0 = vpop.f32.mrb[52].mxu0  ;;  %2472 = vmatprep.mubr.bf16.mxu1 %v1017_v63 }
 0x15f   : > { %v946_v1 = vpop.f32.mrb[53].mxu0  ;;  %2473 = vmatmul.mubr.bf16.gmra.mrb[44].mxu1 %v1018_v62  ;;  %v955_v3 = vadd.f32 %v2398_v0, %v3265_v60 }
 0x160   : > { %v2399_v2 = vpop.f32.mrb[54].mxu0  ;;  %v947_v6 = vadd.f32 %v3265_v60, %v946_v1 }
 0x161   : > { %v958_v4 = vadd.f32 %v2399_v2, %v3265_v60  ;;  %v949_v5 = vpop.f32.mrb[55].mxu0 }
 0x162   : > { %v950_v7 = vadd.f32 %v3265_v60, %v949_v5 }
 0x163   : > { %v1020_v8 = vpack.c.bf16 %v958_v4, %v955_v3 }
 0x164   : > { %v1019_v9 = vpack.c.bf16 %v950_v7, %v947_v6  ;;  %v1355_v7 = vld [vmem:[%s3850_s9 + $0x50] sm:$0xff] }
 0x166   : > { %v2402_v10 = vpop.f32.mrb[56].mxu0  ;;  %2476 = vmatprep.mubr.bf16.mxu1 %v1019_v9 }
 0x167   : > { %v962_v11 = vpop.f32.mrb[57].mxu0  ;;  %2477 = vmatmul.mubr.bf16.gmra.mrb[48].mxu1 %v1020_v8  ;;  %v971_v13 = vadd.f32 %v2402_v10, %v3265_v60  ;;  %v1356_v10 = vld [vmem:[%s3850_s9 + $0x58] sm:$0xff] }
 0x168   : > { %v2403_v12 = vpop.f32.mrb[58].mxu0  ;;  %v963_v16 = vadd.f32 %v3265_v60, %v962_v11  ;;  %v1353_v11 = vld [vmem:[%s3850_s9 + $0x40] sm:$0xff] }
 0x169   : > { %v974_v14 = vadd.f32 %v2403_v12, %v3265_v60  ;;  %v965_v15 = vpop.f32.mrb[59].mxu0 }
 0x16a   : > { %v966_v17 = vadd.f32 %v3265_v60, %v965_v15 }
 0x16b   : > { %v1022_v18 = vpack.c.bf16 %v974_v14, %v971_v13  ;;  %v1354_v14 = vld [vmem:[%s3850_s9 + $0x48] sm:$0xff] }
 0x16c   : > { %v1021_v19 = vpack.c.bf16 %v966_v17, %v963_v16 }
 0x16e   : > { %v2406_v20 = vpop.f32.mrb[60].mxu0  ;;  %2480 = vmatprep.mubr.bf16.mxu1 %v1021_v19 }
 0x16f   : > { %v978_v21 = vpop.f32.mrb[61].mxu0  ;;  %2481 = vmatmul.mubr.bf16.gmra.mrb[52].mxu1 %v1022_v18  ;;  %v987_v23 = vadd.f32 %v2406_v20, %v3265_v60 }
 0x170   : > { %v2407_v22 = vpop.f32.mrb[62].mxu0  ;;  %v979_v26 = vadd.f32 %v3265_v60, %v978_v21 }
 0x171   : > { %v990_v24 = vadd.f32 %v2407_v22, %v3265_v60  ;;  %v981_v25 = vpop.f32.mrb[63].mxu0 }
 0x172   : > { %v982_v27 = vadd.f32 %v3265_v60, %v981_v25  ;;  %v1359_v25 = vld [vmem:[%s3850_s9 + $0x70] sm:$0xff] }
 0x173   : > { %v1024_v28 = vpack.c.bf16 %v990_v24, %v987_v23 }
 0x174   : > { %v1023_v29 = vpack.c.bf16 %v982_v27, %v979_v26 }
 0x176   : > { %2484 = vmatprep.mubr.bf16.mxu1 %v1023_v29  ;;  %v1357_v29 = vld [vmem:[%s3850_s9 + $0x60] sm:$0xff] }
 0x177   : > { %2485 = vmatmul.mubr.bf16.gmra.mrb[56].mxu1 %v1024_v28  ;;  %v1360_v28 = vld [vmem:[%s3850_s9 + $0x78] sm:$0xff] }
 0x1d2   : > { %v2426_v31 = vpop.f32.mrb[64].mxu0 }
 0x1d3   : > { %v1099_v32 = vadd.f32 %v2426_v31, %v3334_v30  ;;  %v1090_v33 = vpop.f32.mrb[65].mxu0 }
 0x1d4   : > { %v1091_v60 = vadd.f32 %v3334_v30, %v1090_v33  ;;  %v2427_v35 = vpop.f32.mrb[66].mxu0  ;;  %v1358_v33 = vld [vmem:[%s3850_s9 + $0x68] sm:$0xff] }
 0x1d5   : > { %v1102_v39 = vadd.f32 %v2427_v35, %v3334_v30  ;;  %v1093_v40 = vpop.f32.mrb[67].mxu0  ;;  %v1411_v43 = vmul.f32 %v1347_v34, %v1099_v32 }
 0x1d6   : > { %v1094_v42 = vadd.f32 %v3334_v30, %v1093_v40  ;;  %v1409_v45 = vmul.f32 %v1345_v38, %v1091_v60 }
 0x1d7   : > { %v1412_v44 = vmul.f32 %v1348_v36, %v1102_v39 }
 0x1d8   : > { %v1410_v46 = vmul.f32 %v1346_v41, %v1094_v42 }
 0x1d9   : > { %v1474_v47 = vpack.c.bf16 %v1412_v44, %v1411_v43  ;;  %v1363_v43 = vld [vmem:[%s3850_s9 + $0x90] sm:$0xff] }
 0x1da   : > { %v1473_v48 = vpack.c.bf16 %v1410_v46, %v1409_v45  ;;  %v2430_v49 = vpop.f32.mrb[0].mxu1  ;;  %v1364_v46 = vld [vmem:[%s3850_s9 + $0x98] sm:$0xff] }
 0x1db   : > { %1506 = vst [vmem:[#allocation2 + $0x8] sm:$0xff] %v1474_v47  ;;  %v1115_v50 = vadd.f32 %v2430_v49, %v3334_v30  ;;  %v1106_v51 = vpop.f32.mrb[1].mxu1  ;;  %v1361_v47 = vld [vmem:[%s3850_s9 + $0x80] sm:$0xff] }
 0x1dc   : > { %1505 = vst [vmem:[#allocation2] sm:$0xff] %v1473_v48  ;;  %v1107_v53 = vadd.f32 %v3334_v30, %v1106_v51  ;;  %v2431_v54 = vpop.f32.mrb[2].mxu1 }
 0x1dd   : > { %v1118_v57 = vadd.f32 %v2431_v54, %v3334_v30  ;;  %v1109_v58 = vpop.f32.mrb[3].mxu1  ;;  %v1415_v62 = vmul.f32 %v1351_v52, %v1115_v50  ;;  %v1362_v50 = vld [vmem:[%s3850_s9 + $0x88] sm:$0xff] }
 0x1de   : > { %v1110_v61 = vadd.f32 %v3334_v30, %v1109_v58  ;;  %v1413_v0 = vmul.f32 %v1349_v56, %v1107_v53 }
 0x1df   : > { %v1416_v63 = vmul.f32 %v1352_v55, %v1118_v57 }
 0x1e0   : > { %v1414_v1 = vmul.f32 %v1350_v59, %v1110_v61 }
 0x1e1   : > { %v1476_v2 = vpack.c.bf16 %v1416_v63, %v1415_v62  ;;  %v1367_v62 = vld [vmem:[%s3850_s9 + $0xb0] sm:$0xff] }
 0x1e2   : > { %v1475_v3 = vpack.c.bf16 %v1414_v1, %v1413_v0  ;;  %v2434_v4 = vpop.f32.mrb[4].mxu1  ;;  %v1368_v1 = vld [vmem:[%s3850_s9 + $0xb8] sm:$0xff] }
 0x1e3   : > { %1508 = vst [vmem:[#allocation2 + $0x18] sm:$0xff] %v1476_v2  ;;  %v1131_v5 = vadd.f32 %v2434_v4, %v3334_v30  ;;  %v1122_v6 = vpop.f32.mrb[5].mxu1  ;;  %v1365_v2 = vld [vmem:[%s3850_s9 + $0xa0] sm:$0xff] }
 0x1e4   : > { %1507 = vst [vmem:[#allocation2 + $0x10] sm:$0xff] %v1475_v3  ;;  %v1123_v8 = vadd.f32 %v3334_v30, %v1122_v6  ;;  %v2435_v9 = vpop.f32.mrb[6].mxu1 }
 0x1e5   : > { %v1134_v12 = vadd.f32 %v2435_v9, %v3334_v30  ;;  %v1125_v13 = vpop.f32.mrb[7].mxu1  ;;  %v1419_v16 = vmul.f32 %v1355_v7, %v1131_v5  ;;  %v1366_v5 = vld [vmem:[%s3850_s9 + $0xa8] sm:$0xff] }
 0x1e6   : > { %v1126_v15 = vadd.f32 %v3334_v30, %v1125_v13  ;;  %v1417_v18 = vmul.f32 %v1353_v11, %v1123_v8 }
 0x1e7   : > { %v1420_v17 = vmul.f32 %v1356_v10, %v1134_v12 }
 0x1e8   : > { %v1418_v19 = vmul.f32 %v1354_v14, %v1126_v15 }
 0x1e9   : > { %v1478_v20 = vpack.c.bf16 %v1420_v17, %v1419_v16  ;;  %v1371_v16 = vld [vmem:[%s3850_s9 + $0xd0] sm:$0xff] }
 0x1ea   : > { %v1477_v21 = vpack.c.bf16 %v1418_v19, %v1417_v18  ;;  %v2438_v22 = vpop.f32.mrb[8].mxu1  ;;  %v1372_v19 = vld [vmem:[%s3850_s9 + $0xd8] sm:$0xff] }
 0x1eb   : > { %1510 = vst [vmem:[#allocation2 + $0x28] sm:$0xff] %v1478_v20  ;;  %v1147_v23 = vadd.f32 %v2438_v22, %v3334_v30  ;;  %v1138_v24 = vpop.f32.mrb[9].mxu1  ;;  %v1369_v20 = vld [vmem:[%s3850_s9 + $0xc0] sm:$0xff] }
 0x1ec   : > { %1509 = vst [vmem:[#allocation2 + $0x20] sm:$0xff] %v1477_v21  ;;  %v1139_v26 = vadd.f32 %v3334_v30, %v1138_v24  ;;  %v2439_v27 = vpop.f32.mrb[10].mxu1 }
 0x1ed   : > { %v1150_v31 = vadd.f32 %v2439_v27, %v3334_v30  ;;  %v1141_v32 = vpop.f32.mrb[11].mxu1  ;;  %v1423_v60 = vmul.f32 %v1359_v25, %v1147_v23  ;;  %v1370_v23 = vld [vmem:[%s3850_s9 + $0xc8] sm:$0xff] }
 0x1ee   : > { %v1142_v34 = vadd.f32 %v3334_v30, %v1141_v32  ;;  %v1421_v36 = vmul.f32 %v1357_v29, %v1139_v26 }
 0x1ef   : > { %v1424_v35 = vmul.f32 %v1360_v28, %v1150_v31 }
 0x1f0   : > { %v1422_v37 = vmul.f32 %v1358_v33, %v1142_v34 }
 0x1f1   : > { %v1480_v38 = vpack.c.bf16 %v1424_v35, %v1423_v60  ;;  %v1375_v60 = vld [vmem:[%s3850_s9 + $0xf0] sm:$0xff] }
 0x1f2   : > { %v1479_v39 = vpack.c.bf16 %v1422_v37, %v1421_v36  ;;  %v2442_v40 = vpop.f32.mrb[12].mxu1  ;;  %v1376_v37 = vld [vmem:[%s3850_s9 + $0xf8] sm:$0xff] }
 0x1f3   : > { %1512 = vst [vmem:[#allocation2 + $0x38] sm:$0xff] %v1480_v38  ;;  %v1163_v41 = vadd.f32 %v2442_v40, %v3334_v30  ;;  %v1154_v42 = vpop.f32.mrb[13].mxu1  ;;  %v1373_v38 = vld [vmem:[%s3850_s9 + $0xe0] sm:$0xff] }
 0x1f4   : > { %1511 = vst [vmem:[#allocation2 + $0x30] sm:$0xff] %v1479_v39  ;;  %v1155_v44 = vadd.f32 %v3334_v30, %v1154_v42  ;;  %v2443_v45 = vpop.f32.mrb[14].mxu1 }
 0x1f5   : > { %v1166_v48 = vadd.f32 %v2443_v45, %v3334_v30  ;;  %v1157_v49 = vpop.f32.mrb[15].mxu1  ;;  %v1427_v52 = vmul.f32 %v1363_v43, %v1163_v41  ;;  %v1374_v41 = vld [vmem:[%s3850_s9 + $0xe8] sm:$0xff] }
 0x1f6   : > { %v1158_v51 = vadd.f32 %v3334_v30, %v1157_v49  ;;  %v1425_v54 = vmul.f32 %v1361_v47, %v1155_v44 }
 0x1f7   : > { %v1428_v53 = vmul.f32 %v1364_v46, %v1166_v48 }
 0x1f8   : > { %v1426_v55 = vmul.f32 %v1362_v50, %v1158_v51 }
 0x1f9   : > { %v1482_v56 = vpack.c.bf16 %v1428_v53, %v1427_v52  ;;  %v1379_v52 = vld [vmem:[%s3850_s9 + $0x110] sm:$0xff] }
 0x1fa   : > { %v1481_v57 = vpack.c.bf16 %v1426_v55, %v1425_v54  ;;  %v2446_v58 = vpop.f32.mrb[16].mxu1  ;;  %v1380_v55 = vld [vmem:[%s3850_s9 + $0x118] sm:$0xff] }
 0x1fb   : > { %1514 = vst [vmem:[#allocation2 + $0x48] sm:$0xff] %v1482_v56  ;;  %v1179_v59 = vadd.f32 %v2446_v58, %v3334_v30  ;;  %v1170_v61 = vpop.f32.mrb[17].mxu1  ;;  %v1377_v56 = vld [vmem:[%s3850_s9 + $0x100] sm:$0xff] }
 0x1fc   : > { %1513 = vst [vmem:[#allocation2 + $0x40] sm:$0xff] %v1481_v57  ;;  %v1171_v63 = vadd.f32 %v3334_v30, %v1170_v61  ;;  %v2447_v0 = vpop.f32.mrb[18].mxu1 }
 0x1fd   : > { %v1182_v3 = vadd.f32 %v2447_v0, %v3334_v30  ;;  %v1173_v4 = vpop.f32.mrb[19].mxu1  ;;  %v1431_v7 = vmul.f32 %v1367_v62, %v1179_v59  ;;  %v1378_v59 = vld [vmem:[%s3850_s9 + $0x108] sm:$0xff] }
 0x1fe   : > { %v1174_v6 = vadd.f32 %v3334_v30, %v1173_v4  ;;  %v1429_v9 = vmul.f32 %v1365_v2, %v1171_v63 }
 0x1ff   : > { %v1432_v8 = vmul.f32 %v1368_v1, %v1182_v3 }
 0x200   : > { %v1430_v10 = vmul.f32 %v1366_v5, %v1174_v6 }
 0x201   : > { %v1484_v11 = vpack.c.bf16 %v1432_v8, %v1431_v7  ;;  %v1383_v7 = vld [vmem:[%s3850_s9 + $0x130] sm:$0xff] }
 0x202   : > { %v1483_v12 = vpack.c.bf16 %v1430_v10, %v1429_v9  ;;  %v2450_v13 = vpop.f32.mrb[20].mxu1  ;;  %v1384_v10 = vld [vmem:[%s3850_s9 + $0x138] sm:$0xff] }
 0x203   : > { %1516 = vst [vmem:[#allocation2 + $0x58] sm:$0xff] %v1484_v11  ;;  %v1195_v14 = vadd.f32 %v2450_v13, %v3334_v30  ;;  %v1186_v15 = vpop.f32.mrb[21].mxu1  ;;  %v1381_v11 = vld [vmem:[%s3850_s9 + $0x120] sm:$0xff] }
 0x204   : > { %1515 = vst [vmem:[#allocation2 + $0x50] sm:$0xff] %v1483_v12  ;;  %v1187_v17 = vadd.f32 %v3334_v30, %v1186_v15  ;;  %v2451_v18 = vpop.f32.mrb[22].mxu1 }
 0x205   : > { %v1198_v21 = vadd.f32 %v2451_v18, %v3334_v30  ;;  %v1189_v22 = vpop.f32.mrb[23].mxu1  ;;  %v1435_v25 = vmul.f32 %v1371_v16, %v1195_v14  ;;  %v1382_v14 = vld [vmem:[%s3850_s9 + $0x128] sm:$0xff] }
 0x206   : > { %v1190_v24 = vadd.f32 %v3334_v30, %v1189_v22  ;;  %v1433_v27 = vmul.f32 %v1369_v20, %v1187_v17 }
 0x207   : > { %v1436_v26 = vmul.f32 %v1372_v19, %v1198_v21 }
 0x208   : > { %v1434_v28 = vmul.f32 %v1370_v23, %v1190_v24 }
 0x209   : > { %v1486_v29 = vpack.c.bf16 %v1436_v26, %v1435_v25  ;;  %v1387_v25 = vld [vmem:[%s3850_s9 + $0x150] sm:$0xff] }
 0x20a   : > { %v1485_v31 = vpack.c.bf16 %v1434_v28, %v1433_v27  ;;  %v2454_v32 = vpop.f32.mrb[24].mxu1  ;;  %v1388_v28 = vld [vmem:[%s3850_s9 + $0x158] sm:$0xff] }
 0x20b   : > { %1518 = vst [vmem:[#allocation2 + $0x68] sm:$0xff] %v1486_v29  ;;  %v1211_v33 = vadd.f32 %v2454_v32, %v3334_v30  ;;  %v1202_v34 = vpop.f32.mrb[25].mxu1  ;;  %v1385_v29 = vld [vmem:[%s3850_s9 + $0x140] sm:$0xff] }
 0x20c   : > { %1517 = vst [vmem:[#allocation2 + $0x60] sm:$0xff] %v1485_v31  ;;  %v1203_v35 = vadd.f32 %v3334_v30, %v1202_v34  ;;  %v2455_v36 = vpop.f32.mrb[26].mxu1 }
 0x20d   : > { %v1214_v39 = vadd.f32 %v2455_v36, %v3334_v30  ;;  %v1205_v40 = vpop.f32.mrb[27].mxu1  ;;  %v1439_v43 = vmul.f32 %v1375_v60, %v1211_v33  ;;  %v1386_v33 = vld [vmem:[%s3850_s9 + $0x148] sm:$0xff] }
 0x20e   : > { %v1206_v42 = vadd.f32 %v3334_v30, %v1205_v40  ;;  %v1437_v45 = vmul.f32 %v1373_v38, %v1203_v35 }
 0x20f   : > { %v1440_v44 = vmul.f32 %v1376_v37, %v1214_v39 }
 0x210   : > { %v1438_v46 = vmul.f32 %v1374_v41, %v1206_v42 }
 0x211   : > { %v1488_v47 = vpack.c.bf16 %v1440_v44, %v1439_v43  ;;  %v1391_v43 = vld [vmem:[%s3850_s9 + $0x170] sm:$0xff] }
 0x212   : > { %v1487_v48 = vpack.c.bf16 %v1438_v46, %v1437_v45  ;;  %v2458_v49 = vpop.f32.mrb[28].mxu1  ;;  %v1392_v46 = vld [vmem:[%s3850_s9 + $0x178] sm:$0xff] }
 0x213   : > { %1520 = vst [vmem:[#allocation2 + $0x78] sm:$0xff] %v1488_v47  ;;  %v1227_v50 = vadd.f32 %v2458_v49, %v3334_v30  ;;  %v1218_v51 = vpop.f32.mrb[29].mxu1  ;;  %v1389_v47 = vld [vmem:[%s3850_s9 + $0x160] sm:$0xff] }
 0x214   : > { %1519 = vst [vmem:[#allocation2 + $0x70] sm:$0xff] %v1487_v48  ;;  %v1219_v53 = vadd.f32 %v3334_v30, %v1218_v51  ;;  %v2459_v54 = vpop.f32.mrb[30].mxu1 }
 0x215   : > { %v1230_v57 = vadd.f32 %v2459_v54, %v3334_v30  ;;  %v1221_v58 = vpop.f32.mrb[31].mxu1  ;;  %v1443_v62 = vmul.f32 %v1379_v52, %v1227_v50  ;;  %v1390_v50 = vld [vmem:[%s3850_s9 + $0x168] sm:$0xff] }
 0x216   : > { %v1222_v61 = vadd.f32 %v3334_v30, %v1221_v58  ;;  %v1441_v0 = vmul.f32 %v1377_v56, %v1219_v53 }
 0x217   : > { %v1444_v63 = vmul.f32 %v1380_v55, %v1230_v57 }
 0x218   : > { %v1442_v1 = vmul.f32 %v1378_v59, %v1222_v61 }
 0x219   : > { %v1490_v2 = vpack.c.bf16 %v1444_v63, %v1443_v62  ;;  %v1395_v62 = vld [vmem:[%s3850_s9 + $0x190] sm:$0xff] }
 0x21a   : > { %v1489_v3 = vpack.c.bf16 %v1442_v1, %v1441_v0  ;;  %v2462_v4 = vpop.f32.mrb[32].mxu1  ;;  %v1396_v1 = vld [vmem:[%s3850_s9 + $0x198] sm:$0xff] }
 0x21b   : > { %1522 = vst [vmem:[#allocation2 + $0x88] sm:$0xff] %v1490_v2  ;;  %v1243_v5 = vadd.f32 %v2462_v4, %v3334_v30  ;;  %v1234_v6 = vpop.f32.mrb[33].mxu1  ;;  %v1393_v2 = vld [vmem:[%s3850_s9 + $0x180] sm:$0xff] }
 0x21c   : > { %1521 = vst [vmem:[#allocation2 + $0x80] sm:$0xff] %v1489_v3  ;;  %v1235_v8 = vadd.f32 %v3334_v30, %v1234_v6  ;;  %v2463_v9 = vpop.f32.mrb[34].mxu1 }
 0x21d   : > { %v1246_v12 = vadd.f32 %v2463_v9, %v3334_v30  ;;  %v1237_v13 = vpop.f32.mrb[35].mxu1  ;;  %v1447_v16 = vmul.f32 %v1383_v7, %v1243_v5  ;;  %v1394_v5 = vld [vmem:[%s3850_s9 + $0x188] sm:$0xff] }
 0x21e   : > { %v1238_v15 = vadd.f32 %v3334_v30, %v1237_v13  ;;  %v1445_v18 = vmul.f32 %v1381_v11, %v1235_v8 }
 0x21f   : > { %v1448_v17 = vmul.f32 %v1384_v10, %v1246_v12 }
 0x220   : > { %v1446_v19 = vmul.f32 %v1382_v14, %v1238_v15 }
 0x221   : > { %v1492_v20 = vpack.c.bf16 %v1448_v17, %v1447_v16  ;;  %v1399_v16 = vld [vmem:[%s3850_s9 + $0x1b0] sm:$0xff] }
 0x222   : > { %v1491_v21 = vpack.c.bf16 %v1446_v19, %v1445_v18  ;;  %v2466_v22 = vpop.f32.mrb[36].mxu1  ;;  %v1400_v19 = vld [vmem:[%s3850_s9 + $0x1b8] sm:$0xff] }
 0x223   : > { %1524 = vst [vmem:[#allocation2 + $0x98] sm:$0xff] %v1492_v20  ;;  %v1259_v23 = vadd.f32 %v2466_v22, %v3334_v30  ;;  %v1250_v24 = vpop.f32.mrb[37].mxu1  ;;  %v1397_v20 = vld [vmem:[%s3850_s9 + $0x1a0] sm:$0xff] }
 0x224   : > { %1523 = vst [vmem:[#allocation2 + $0x90] sm:$0xff] %v1491_v21  ;;  %v1251_v26 = vadd.f32 %v3334_v30, %v1250_v24  ;;  %v2467_v27 = vpop.f32.mrb[38].mxu1 }
 0x225   : > { %v1262_v31 = vadd.f32 %v2467_v27, %v3334_v30  ;;  %v1253_v32 = vpop.f32.mrb[39].mxu1  ;;  %v1451_v60 = vmul.f32 %v1387_v25, %v1259_v23  ;;  %v1398_v23 = vld [vmem:[%s3850_s9 + $0x1a8] sm:$0xff] }
 0x226   : > { %v1254_v34 = vadd.f32 %v3334_v30, %v1253_v32  ;;  %v1449_v36 = vmul.f32 %v1385_v29, %v1251_v26 }
 0x227   : > { %v1452_v35 = vmul.f32 %v1388_v28, %v1262_v31 }
 0x228   : > { %v1450_v37 = vmul.f32 %v1386_v33, %v1254_v34 }
 0x229   : > { %v1494_v38 = vpack.c.bf16 %v1452_v35, %v1451_v60  ;;  %v1403_v60 = vld [vmem:[%s3850_s9 + $0x1d0] sm:$0xff] }
 0x22a   : > { %v1493_v39 = vpack.c.bf16 %v1450_v37, %v1449_v36  ;;  %v2470_v40 = vpop.f32.mrb[40].mxu1  ;;  %v1404_v37 = vld [vmem:[%s3850_s9 + $0x1d8] sm:$0xff] }
 0x22b   : > { %1526 = vst [vmem:[#allocation2 + $0xa8] sm:$0xff] %v1494_v38  ;;  %v1275_v41 = vadd.f32 %v2470_v40, %v3334_v30  ;;  %v1266_v42 = vpop.f32.mrb[41].mxu1  ;;  %v1401_v38 = vld [vmem:[%s3850_s9 + $0x1c0] sm:$0xff] }
 0x22c   : > { %1525 = vst [vmem:[#allocation2 + $0xa0] sm:$0xff] %v1493_v39  ;;  %v1267_v44 = vadd.f32 %v3334_v30, %v1266_v42  ;;  %v2471_v45 = vpop.f32.mrb[42].mxu1 }
 0x22d   : > { %v1278_v48 = vadd.f32 %v2471_v45, %v3334_v30  ;;  %v1269_v49 = vpop.f32.mrb[43].mxu1  ;;  %v1455_v52 = vmul.f32 %v1391_v43, %v1275_v41  ;;  %v1402_v41 = vld [vmem:[%s3850_s9 + $0x1c8] sm:$0xff] }
 0x22e   : > { %v1270_v51 = vadd.f32 %v3334_v30, %v1269_v49  ;;  %v1453_v54 = vmul.f32 %v1389_v47, %v1267_v44 }
 0x22f   : > { %v1456_v53 = vmul.f32 %v1392_v46, %v1278_v48 }
 0x230   : > { %v1454_v55 = vmul.f32 %v1390_v50, %v1270_v51 }
 0x231   : > { %v1496_v56 = vpack.c.bf16 %v1456_v53, %v1455_v52  ;;  %v1407_v52 = vld [vmem:[%s3850_s9 + $0x1f0] sm:$0xff] }
 0x232   : > { %v1495_v57 = vpack.c.bf16 %v1454_v55, %v1453_v54  ;;  %v2474_v58 = vpop.f32.mrb[44].mxu1  ;;  %v1408_v55 = vld [vmem:[%s3850_s9 + $0x1f8] sm:$0xff] }
 0x233   : > { %1528 = vst [vmem:[#allocation2 + $0xb8] sm:$0xff] %v1496_v56  ;;  %v1291_v59 = vadd.f32 %v2474_v58, %v3334_v30  ;;  %v1282_v61 = vpop.f32.mrb[45].mxu1  ;;  %v1405_v56 = vld [vmem:[%s3850_s9 + $0x1e0] sm:$0xff] }
 0x234   : > { %1527 = vst [vmem:[#allocation2 + $0xb0] sm:$0xff] %v1495_v57  ;;  %v1283_v63 = vadd.f32 %v3334_v30, %v1282_v61  ;;  %v2475_v0 = vpop.f32.mrb[46].mxu1 }
 0x235   : > { %v1294_v3 = vadd.f32 %v2475_v0, %v3334_v30  ;;  %v1285_v4 = vpop.f32.mrb[47].mxu1  ;;  %v1459_v7 = vmul.f32 %v1395_v62, %v1291_v59  ;;  %v1406_v59 = vld [vmem:[%s3850_s9 + $0x1e8] sm:$0xff] }
 0x236   : > { %v1286_v6 = vadd.f32 %v3334_v30, %v1285_v4  ;;  %v1457_v9 = vmul.f32 %v1393_v2, %v1283_v63 }
 0x237   : > { %v1460_v8 = vmul.f32 %v1396_v1, %v1294_v3 }
 0x238   : > { %v1458_v10 = vmul.f32 %v1394_v5, %v1286_v6 }
 0x239   : > { %v1498_v11 = vpack.c.bf16 %v1460_v8, %v1459_v7 }
 0x23a   : > { %v1497_v12 = vpack.c.bf16 %v1458_v10, %v1457_v9  ;;  %v2478_v13 = vpop.f32.mrb[48].mxu1 }
 0x23b   : > { %1530 = vst [vmem:[#allocation2 + $0xc8] sm:$0xff] %v1498_v11  ;;  %v1307_v14 = vadd.f32 %v2478_v13, %v3334_v30  ;;  %v1298_v15 = vpop.f32.mrb[49].mxu1 }
 0x23c   : > { %1529 = vst [vmem:[#allocation2 + $0xc0] sm:$0xff] %v1497_v12  ;;  %v1299_v17 = vadd.f32 %v3334_v30, %v1298_v15  ;;  %v2479_v18 = vpop.f32.mrb[50].mxu1 }
 0x23d   : > { %v1310_v21 = vadd.f32 %v2479_v18, %v3334_v30  ;;  %v1301_v22 = vpop.f32.mrb[51].mxu1  ;;  %v1463_v25 = vmul.f32 %v1399_v16, %v1307_v14 }
 0x23e   : > { %v1302_v24 = vadd.f32 %v3334_v30, %v1301_v22  ;;  %v1461_v27 = vmul.f32 %v1397_v20, %v1299_v17 }
 0x23f   : > { %v1464_v26 = vmul.f32 %v1400_v19, %v1310_v21 }
 0x240   : > { %v1462_v28 = vmul.f32 %v1398_v23, %v1302_v24 }
 0x241   : > { %v1500_v29 = vpack.c.bf16 %v1464_v26, %v1463_v25 }
 0x242   : > { %v1499_v31 = vpack.c.bf16 %v1462_v28, %v1461_v27  ;;  %v2482_v32 = vpop.f32.mrb[52].mxu1 }
 0x243   : > { %1532 = vst [vmem:[#allocation2 + $0xd8] sm:$0xff] %v1500_v29  ;;  %v1323_v33 = vadd.f32 %v2482_v32, %v3334_v30  ;;  %v1314_v34 = vpop.f32.mrb[53].mxu1 }
 0x244   : > { %1531 = vst [vmem:[#allocation2 + $0xd0] sm:$0xff] %v1499_v31  ;;  %v1315_v35 = vadd.f32 %v3334_v30, %v1314_v34  ;;  %v2483_v36 = vpop.f32.mrb[54].mxu1 }
 0x245   : > { %v1326_v39 = vadd.f32 %v2483_v36, %v3334_v30  ;;  %v1317_v40 = vpop.f32.mrb[55].mxu1  ;;  %v1467_v43 = vmul.f32 %v1403_v60, %v1323_v33 }
 0x246   : > { %v1318_v42 = vadd.f32 %v3334_v30, %v1317_v40  ;;  %v1465_v45 = vmul.f32 %v1401_v38, %v1315_v35 }
 0x247   : > { %v1468_v44 = vmul.f32 %v1404_v37, %v1326_v39 }
 0x248   : > { %v1466_v46 = vmul.f32 %v1402_v41, %v1318_v42 }
 0x249   : > { %v1502_v47 = vpack.c.bf16 %v1468_v44, %v1467_v43 }
 0x24a   : > { %v1501_v48 = vpack.c.bf16 %v1466_v46, %v1465_v45  ;;  %v2486_v49 = vpop.f32.mrb[56].mxu1 }
 0x24b   : > { %1534 = vst [vmem:[#allocation2 + $0xe8] sm:$0xff] %v1502_v47  ;;  %v1339_v50 = vadd.f32 %v2486_v49, %v3334_v30  ;;  %v1330_v51 = vpop.f32.mrb[57].mxu1 }
 0x24c   : > { %1533 = vst [vmem:[#allocation2 + $0xe0] sm:$0xff] %v1501_v48  ;;  %v1331_v53 = vadd.f32 %v3334_v30, %v1330_v51  ;;  %v2487_v54 = vpop.f32.mrb[58].mxu1 }
 0x24d   : > { %v1342_v57 = vadd.f32 %v2487_v54, %v3334_v30  ;;  %v1333_v58 = vpop.f32.mrb[59].mxu1  ;;  %v1471_v62 = vmul.f32 %v1407_v52, %v1339_v50 }
 0x24e   : > { %v1334_v61 = vadd.f32 %v3334_v30, %v1333_v58  ;;  %v1469_v0 = vmul.f32 %v1405_v56, %v1331_v53 }
 0x24f   : > { %v1472_v63 = vmul.f32 %v1408_v55, %v1342_v57 }
 0x250   : > { %v1470_v1 = vmul.f32 %v1406_v59, %v1334_v61 }
 0x251   : > { %v1504_v2 = vpack.c.bf16 %v1472_v63, %v1471_v62 }
 0x252   : > { %v1503_v3 = vpack.c.bf16 %v1470_v1, %v1469_v0 }
 0x253   : > { %1536 = vst [vmem:[#allocation2 + $0xf8] sm:$0xff] %v1504_v2 }
 0x254   : > { %1535 = vst [vmem:[#allocation2 + $0xf0] sm:$0xff] %v1503_v3 }
 0x255 PF: > { %p2211_p13 = scmp.ne.s32.totalorder %s2801_s15, 0 }
 0x256   : > { %v1551_v4 = vld [vmem:[%s3843_s2] sm:$0xff] (!%p2211_p13)  ;;  %v1552_v30 = vld [vmem:[%s3843_s2 + $0x8] sm:$0xff] (!%p2211_p13)  ;;  %v1553_v5 = vld [vmem:[%s3843_s2 + $0x10] sm:$0xff] (!%p2211_p13)  ;;  %v2820_v6 = vmov (!%p2211_p13), 0.0   ;;  %vm2821_vm3 = vmmov (!%p2211_p13), 0  }
 0x257   : > { %1547 = sbr.rel (%p2211_p13) target bundleno = 851 (0x353), region = 68  ;;  %2488 = vmatprep.subr.bf16.mxu0 (!%p2211_p13), %v2820_v6  ;;  %v1567_v7 = vpack.c.bf16 (!%p2211_p13), %v1552_v30, %v1551_v4  ;;  %v1554_v8 = vld [vmem:[%s3843_s2 + $0x18] sm:$0xff] (!%p2211_p13)  ;;  %2504 = vmatprep.mubr.msk.bf16.mxu0 (!%p2211_p13), %vm2821_vm3, %v2820_v6  ;;  %v1555_v10 = vld [vmem:[%s3843_s2 + $0x20] sm:$0xff] (!%p2211_p13)  ;;  %v1556_v11 = vld [vmem:[%s3843_s2 + $0x28] sm:$0xff] (!%p2211_p13) }
 0x258   : > { %v1568_v9 = vpack.c.bf16 (!%p2211_p13), %v1554_v8, %v1553_v5  ;;  %v1569_v12 = vpack.c.bf16 (!%p2211_p13), %v1556_v11, %v1555_v10  ;;  %v1557_v13 = vld [vmem:[%s3843_s2 + $0x30] sm:$0xff] (!%p2211_p13)  ;;  %v1558_v14 = vld [vmem:[%s3843_s2 + $0x38] sm:$0xff] (!%p2211_p13)  ;;  %v1559_v16 = vld [vmem:[%s3843_s2 + $0x40] sm:$0xff] (!%p2211_p13) }
 0x259   : > { %2489 = vmatpush3.bf16.msra.mxu0 (!%p2211_p13), %v1567_v7  ;;  %v1570_v15 = vpack.c.bf16 (!%p2211_p13), %v1558_v14, %v1557_v13  ;;  %v1560_v17 = vld [vmem:[%s3843_s2 + $0x48] sm:$0xff] (!%p2211_p13)  ;;  %v1561_v19 = vld [vmem:[%s3843_s2 + $0x50] sm:$0xff] (!%p2211_p13)  ;;  %v1562_v20 = vld [vmem:[%s3843_s2 + $0x58] sm:$0xff] (!%p2211_p13) }
 0x25a   : > { %2490 = vmatprep.subr.bf16.mxu0 (!%p2211_p13), %v2820_v6  ;;  %v1571_v18 = vpack.c.bf16 (!%p2211_p13), %v1560_v17, %v1559_v16  ;;  %v1572_v21 = vpack.c.bf16 (!%p2211_p13), %v1562_v20, %v1561_v19  ;;  %v1563_v22 = vld [vmem:[%s3843_s2 + $0x60] sm:$0xff] (!%p2211_p13)  ;;  %v1564_v23 = vld [vmem:[%s3843_s2 + $0x68] sm:$0xff] (!%p2211_p13)  ;;  %v1565_v25 = vld [vmem:[%s3843_s2 + $0x70] sm:$0xff] (!%p2211_p13) }
 0x25b   : > { %v1573_v24 = vpack.c.bf16 (!%p2211_p13), %v1564_v23, %v1563_v22  ;;  %v1566_v26 = vld [vmem:[%s3843_s2 + $0x78] sm:$0xff] (!%p2211_p13)  ;;  %v1548_v28 = vld [vmem:[%s2975_s23] sm:$0xff] (!%p2211_p13)  ;;  %v1549_v29 = vld [vmem:[%s2975_s23 + $0x8] sm:$0xff] (!%p2211_p13) }
 0x25c   : > { %v1574_v27 = vpack.c.bf16 (!%p2211_p13), %v1566_v26, %v1565_v25  ;;  %v1550_v31 = vpack.c.bf16 (!%p2211_p13), %v1549_v29, %v1548_v28  ;;  %v2212_v32 = vld [vmem:[%s3844_s3] ss:$0 sm:$0xff] (!%p2211_p13) }
 0x25d   : > { %2491 = vmatpush3.bf16.msra.mxu0 (!%p2211_p13), %v1568_v9 }
 0x25e   : > { %2492 = vmatprep.subr.bf16.mxu0 %v2820_v6 }
 0x261   : > { %2493 = vmatpush3.bf16.msra.mxu0 %v1569_v12 }
 0x262   : > { %2494 = vmatprep.subr.bf16.mxu0 %v2820_v6 }
 0x265   : > { %2495 = vmatpush3.bf16.msra.mxu0 %v1570_v15 }
 0x266   : > { %2496 = vmatprep.subr.bf16.mxu0 %v2820_v6 }
 0x269   : > { %2497 = vmatpush3.bf16.msra.mxu0 %v1571_v18 }
 0x26a   : > { %2498 = vmatprep.subr.bf16.mxu0 %v2820_v6 }
 0x26d   : > { %2499 = vmatpush3.bf16.msra.mxu0 %v1572_v21 }
 0x26e   : > { %2500 = vmatprep.subr.bf16.mxu0 %v2820_v6 }
 0x271   : > { %2501 = vmatpush3.bf16.msra.mxu0 %v1573_v24 }
 0x272   : > { %2502 = vmatprep.subr.bf16.mxu0 %v2820_v6 }
 0x275   : > { %2503 = vmatpush3.bf16.msra.mxu0 %v1574_v27 }
 0x278   : > { %2505 = vmatmul.mubr.bf16.vlgmr.msra.gmra.mrb[0].mxu0 %v1550_v31 }
 0x34b   : > { %v1616_v33 = vpop.f32.mrb[0].mxu0 }
 0x34c   : > { %v2506_v34 = vpop.f32.mrb[1].mxu0  ;;  %v1617_v35 = vadd.f32 %v2212_v32, %v1616_v33 }
 0x34d   : > { %v1619_v60 = vpop.f32.mrb[2].mxu0 }
 0x34e   : > { %v1620_v36 = vadd.f32 %v2212_v32, %v1619_v60  ;;  %v2507_v37 = vpop.f32.mrb[3].mxu0 }
 0x350   : > { %v1623_v38 = vpack.c.bf16 %v1620_v36, %v1617_v35 }
 0x352   : > { %1624 = vst [vmem:[#allocation3] sm:$0xff] %v1623_v38 }
 0x353 PF: > { %s2238_s29 = sshll.u32 %s2801_s15, 7  ;;  %v1702_v15 = vld [vmem:[%s2980_s28] sm:$0xff]  ;;  %v1703_v17 = vld [vmem:[%s2980_s28 + $0x8] sm:$0xff]  ;;  %vm1712_vm4 = vcmask 7168   ;;  %vm1787_vm5 = vcmask 0   ;;  %vm1758_vm8 = vcmask 9216   ;;  %p2219_p0 = scmp.ne.s32.totalorder %s2805_s16, %s2801_s15 }
 0x354   : > { %s3647_s23 = scalar_lea.vmem [#allocation2], %s2238_s29  ;;  %v1726_v23 = vsel %vm1712_vm4, %v1702_v15, 0.0  ;;  %v1727_v24 = vsel %vm1712_vm4, %v1703_v17, 0.0  ;;  %vm1841_vm9 = vcmask (!%p2219_p0), 1040384  }
 0x355   : > { %v1637_v40 = vld [vmem:[%s3647_s23 + $0x40] sm:$0xff]  ;;  %v1638_v42 = vld [vmem:[%s3647_s23 + $0x48] sm:$0xff]  ;;  %v1639_v44 = vld [vmem:[%s3647_s23 + $0x50] sm:$0xff]  ;;  %v1728_v26 = vadd.f32 %v1727_v24, %v1726_v23 }
 0x356   : > { %v1629_v41 = vld [vmem:[%s3647_s23] sm:$0xff]  ;;  %2324 = vmatprep.subr.bf16.mxu0 %v1637_v40  ;;  %v1630_v43 = vld [vmem:[%s3647_s23 + $0x8] sm:$0xff]  ;;  %v1631_v45 = vld [vmem:[%s3647_s23 + $0x10] sm:$0xff] }
 0x357   : > { %2325 = vmatpush3.bf16.xpose.msra.mxu0 %v1629_v41  ;;  %v1640_v46 = vld [vmem:[%s3647_s23 + $0x58] sm:$0xff]  ;;  %v1641_v48 = vld [vmem:[%s3647_s23 + $0x60] sm:$0xff]  ;;  %v1642_v50 = vld [vmem:[%s3647_s23 + $0x68] sm:$0xff] }
 0x358   : > { %2326 = vmatprep.subr.bf16.mxu0 %v1638_v42  ;;  %v1632_v47 = vld [vmem:[%s3647_s23 + $0x18] sm:$0xff]  ;;  %v1633_v49 = vld [vmem:[%s3647_s23 + $0x20] sm:$0xff]  ;;  %v1634_v51 = vld [vmem:[%s3647_s23 + $0x28] sm:$0xff] }
 0x359   : > { %v1625_v39 = vld [vmem:[#allocation3] sm:$0xff]  ;;  %v1643_v52 = vld [vmem:[%s3647_s23 + $0x70] sm:$0xff]  ;;  %v1644_v54 = vld [vmem:[%s3647_s23 + $0x78] sm:$0xff] }
 0x35a   : > { %2340 = vmatprep.mubr.bf16.mxu0 %v1625_v39  ;;  %v1635_v53 = vld [vmem:[%s3647_s23 + $0x30] sm:$0xff]  ;;  %v1636_v55 = vld [vmem:[%s3647_s23 + $0x38] sm:$0xff] }
 0x35f   : > { %2327 = vmatpush3.bf16.xpose.msra.mxu0 %v1630_v43 }
 0x360   : > { %2328 = vmatprep.subr.bf16.mxu0 %v1639_v44 }
 0x367   : > { %2329 = vmatpush3.bf16.xpose.msra.mxu0 %v1631_v45 }
 0x368   : > { %2330 = vmatprep.subr.bf16.mxu0 %v1640_v46 }
 0x36f   : > { %2331 = vmatpush3.bf16.xpose.msra.mxu0 %v1632_v47 }
 0x370   : > { %2332 = vmatprep.subr.bf16.mxu0 %v1641_v48  ;;  %v1740_v48 = vlaneseq }
 0x377   : > { %2333 = vmatpush3.bf16.xpose.msra.mxu0 %v1633_v49  ;;  %v1768_v49 = vld [vmem:[#allocation4] sm:$0x1] }
 0x378   : > { %2334 = vmatprep.subr.bf16.mxu0 %v1642_v50 }
 0x37f   : > { %2335 = vmatpush3.bf16.xpose.msra.mxu0 %v1634_v51 }
 0x380   : > { %2336 = vmatprep.subr.bf16.mxu0 %v1643_v52 }
 0x387   : > { %2337 = vmatpush3.bf16.xpose.msra.mxu0 %v1635_v53  ;;  %v3695_v53 = vshrl.u32 %v1740_v48, 7 }
 0x388   : > { %2338 = vmatprep.subr.bf16.mxu0 %v1644_v54  ;;  %v3697_v54 = vand.u32 127, %v1740_v48 }
 0x38f   : > { %2339 = vmatpush3.bf16.xpose.msra.mxu0 %v1636_v55 }
 0x396   : > { %2341 = vmatmul.mubr.bf16.vlgmr.msra.gmra.mrb[0].mxu0 %v1625_v39 }
 0x469   : > { %v3665_v56 = vpop.f32.mrb[0].mxu0 }
 0x46a   : > { %v1760_v57 = vmax.f32 %v3665_v56, -20.0  ;;  %v3668_v58 = vpop.f32.mrb[1].mxu0 }
 0x46b   : > { %v2239_v59 = vpack.c.bf16 %v3668_v58, %v3665_v56  ;;  %v1761_v61 = vmax.f32 %v3668_v58, -20.0  ;;  %v3673_v62 = vpop.f32.mrb[2].mxu0  ;;  %v1704_v63 = vmax.f32 %v3665_v56, %v3668_v58 }
 0x46c   : > { %v1764_v0 = vmin.f32 %v1760_v57, 0.0  ;;  %v1762_v1 = vmax.f32 %v3673_v62, -20.0  ;;  %v3678_v2 = vpop.f32.mrb[3].mxu0  ;;  %v1742_v57 = vstv %s2805_s16 }
 0x46d   : > { %1700 = vst [vmem:[%s2982_s18] sm:$0xff] %v2239_v59  ;;  %v1765_v3 = vmin.f32 %v1761_v61, 0.0  ;;  %v2240_v4 = vpack.c.bf16 %v3678_v2, %v3673_v62  ;;  %v1763_v30 = vmax.f32 %v3678_v2, -20.0  ;;  %1705 = vmax.xlane.f32.xlu0 %v1704_v63  ;;  %v1707_v5 = vmax.f32 %v3673_v62, %v3678_v2 }
 0x46e   : > { %v1769_v6 = vmul.f32 %v1764_v0, %v1764_v0  ;;  %v1766_v7 = vmin.f32 %v1762_v1, 0.0  ;;  %v1748_v59 = vstv %s2801_s15  ;;  %vm1743_vm6 = vcmp.eq.s32.totalorder %v3695_v53, %v1742_v57 }
 0x46f   : > { %v1770_v8 = vmul.f32 %v1765_v3, %v1765_v3  ;;  %1701 = vst [vmem:[%s2982_s18 + $0x8] sm:$0xff] %v2240_v4  ;;  %v1767_v9 = vmin.f32 %v1763_v30, 0.0  ;;  %vm1749_vm7 = vcmp.eq.s32.totalorder %v3697_v54, %v1748_v59  ;;  %v2822_v61 = vmov 0.0  }
 0x470   : > { %v1771_v10 = vmul.f32 %v1766_v7, %v1766_v7  ;;  %v2217_v63 = vsel %vm1743_vm6, 1.0, %v2822_v61  ;;  %v2218_v0 = vsel %vm1749_vm7, 1.0, %v2822_v61 }
 0x471   : > { %1708 = vmax.xlane.f32.xlu0 %v1707_v5  ;;  %v1773_v11 = vadd.f32 %v1770_v8, %v1769_v6  ;;  %v1772_v12 = vmul.f32 %v1767_v9, %v1767_v9  ;;  %v1753_v1 = vmul.f32 %v2218_v0, %v2217_v63  ;;  %v1752_v5 = vld [vmem:[#allocation7] sm:$0x3]  ;;  %v1838_v0 = vld [vmem:[#allocation5] sm:$0x1] (!%p2219_p0) }
 0x473   : > { %v1774_v13 = vadd.f32 %v1773_v11, %v1771_v10 }
 0x475   : > { %v1775_v14 = vadd.f32 %v1774_v13, %v1772_v12 }
 0x477   : > { %1776 = vadd.xlane.f32.xlu0 %v1775_v14 }
 0x4fa   : > { %v3688_v16 = vpop.xlane.xlu0 %1705 }
 0x4fb   : > { %v1710_v18 = vmul.f32 %v3688_v16, %v1702_v15  ;;  %v1793_v8 = vsub.f32 (!%p2219_p0), %v3665_v56, %v3688_v16  ;;  %v1794_v9 = vsub.f32 (!%p2219_p0), %v3668_v58, %v3688_v16 }
 0x4fd   : > { %v1713_v21 = vsel %vm1712_vm4, %v1710_v18, 0.0  ;;  %v1797_v12 = vmul.f32 (!%p2219_p0), 1.442695, %v1793_v8  ;;  %v1799_v13 = vmul.f32 (!%p2219_p0), 1.442695, %v1794_v9 }
 0x4fe   : > { %v3692_v19 = vpop.xlane.xlu0 %1708 }
 0x4ff   : > { %v1711_v20 = vmul.f32 %v3692_v19, %v1703_v17  ;;  %v1795_v10 = vsub.f32 (!%p2219_p0), %v3673_v62, %v3692_v19  ;;  %v1796_v11 = vsub.f32 (!%p2219_p0), %v3678_v2, %v3692_v19 }
 0x501   : > { %v1714_v22 = vsel %vm1712_vm4, %v1711_v20, 0.0  ;;  %v1801_v14 = vmul.f32 (!%p2219_p0), 1.442695, %v1795_v10  ;;  %v1803_v15 = vmul.f32 (!%p2219_p0), 1.442695, %v1796_v11 }
 0x502   : > { %v1715_v25 = vadd.f32 %v1714_v22, %v1713_v21 }
 0x504   : > { %1716 = vadd.xlane.f32.xlu1 %v1715_v25  ;;  %v1777_v27 = vpop.xlane.xlu0 %1776 }
 0x505   : > { %v1778_v28 = vrot.slane %v1777_v27, 4 }
 0x507   : > { %v1779_v29 = vadd.f32 %v1778_v28, %v1777_v27 }
 0x508   : > { %1729 = vadd.xlane.f32.xlu1 %v1728_v26 }
 0x509   : > { %v1780_v34 = vrot.slane %v1779_v29, 2 }
 0x50b   : > { %v1781_v39 = vadd.f32 %v1780_v34, %v1779_v29 }
 0x50d   : > { %v1782_v44 = vrot.slane %v1781_v39, 1 }
 0x50f   : > { %v1783_v47 = vadd.f32 %v1782_v44, %v1781_v39 }
 0x591   : > { %v1717_v31 = vpop.xlane.xlu1 %1716 }
 0x592   : > { %v1718_v32 = vrot.slane %v1717_v31, 4 }
 0x594   : > { %v1719_v33 = vadd.f32 %v1718_v32, %v1717_v31 }
 0x595   : > { %v1730_v60 = vpop.xlane.xlu1 %1729 }
 0x596   : > { %v1720_v35 = vrot.slane %v1719_v33, 2  ;;  %v1731_v36 = vrot.slane %v1730_v60, 4 }
 0x598   : > { %v1732_v37 = vadd.f32 %v1731_v36, %v1730_v60  ;;  %v1721_v38 = vadd.f32 %v1720_v35, %v1719_v33 }
 0x59a   : > { %v1733_v40 = vrot.slane %v1732_v37, 2  ;;  %v1722_v41 = vrot.slane %v1721_v38, 1 }
 0x59c   : > { %v1734_v42 = vadd.f32 %v1733_v40, %v1732_v37  ;;  %v1723_v43 = vadd.f32 %v1722_v41, %v1721_v38 }
 0x59e   : > { %2524 = vpush %v1723_v43  ;;  %v1735_v45 = vrot.slane %v1734_v42, 1 }
 0x5a0   : > { %v1736_v46 = vadd.f32 %v1735_v45, %v1734_v42 }
 0x5a2   : > { %2526 = vpush %v1736_v46 }
 0x5a3   : > { %2528 = vpush %v1783_v47 }
 0x5cf   : > { %s2525_s28 = spop %2524 }
 0x5d0   : > { %v1725_v4 = vstv %s2525_s28 }
 0x5d3   : > { %s2527_s20 = spop %2526 }
 0x5d4   : > { %v1738_v50 = vstv %s2527_s20  ;;  %s2529_s22 = spop %2528 }
 0x5d5   : > { %v1739_v51 = vmax.f32 %v1738_v50, 1e-07  ;;  %v1785_v52 = vstv %s2529_s22 }
 0x5d6   : > { %v1786_v55 = vadd.f32 %v1785_v52, %v1768_v49 }
 0x5d7   : > { %2625 = vrcp.f32 %v1739_v51 }
 0x5d8   : > { %1788 = vst.msk [vmem:[#allocation4] sm:$0x1] %vm1787_vm5, %v1786_v55  ;;  %2627 = vpow2.f32 (!%p2219_p0), %v1797_v12 }
 0x5d9   : > { %2629 = vpow2.f32 (!%p2219_p0), %v1799_v13 }
 0x5da   : > { %2631 = vpow2.f32 (!%p2219_p0), %v1801_v14 }
 0x5db   : > { %2633 = vpow2.f32 (!%p2219_p0), %v1803_v15 }
 0x5e1   : > { %v2626_v3 = vpop.eup %2625 }
 0x5e2   : > { %v1755_v30 = vmul.f32 %v2626_v3, %v1725_v4  ;;  %1792 = sbr.rel (%p2219_p0) target bundleno = 1902 (0x76e), region = 72  ;;  %v2628_v17 = vpop.eup (!%p2219_p0), %2627 }
 0x5e3   : > { %v2630_v18 = vpop.eup (!%p2219_p0), %2629 }
 0x5e4   : > { %v1756_v6 = vmul.f32 %v1755_v30, %v1753_v1  ;;  %v2632_v56 = vpop.eup (!%p2219_p0), %2631  ;;  %v1805_v20 = vadd.f32 (!%p2219_p0), %v2630_v18, %v2628_v17 }
 0x5e5   : > { %v2634_v21 = vpop.eup (!%p2219_p0), %2633 }
 0x5e6   : > { %v1757_v7 = vadd.f32 %v1756_v6, %v1752_v5  ;;  %1806 = vadd.xlane.f32.xlu0 (!%p2219_p0), %v1805_v20  ;;  %v1808_v58 = vadd.f32 (!%p2219_p0), %v2634_v21, %v2632_v56 }
 0x5e8   : > { %1759 = vst.msk [vmem:[#allocation7] sm:$0x3] %vm1758_vm8, %v1757_v7 }
 0x5ea   : > { %1809 = vadd.xlane.f32.xlu0 %v1808_v58 }
 0x673   : > { %v1807_v62 = vpop.xlane.xlu0 %1806 }
 0x674   : > { %2635 = vrcp.f32 %v1807_v62 }
 0x677   : > { %v1810_v16 = vpop.xlane.xlu0 %1809 }
 0x678   : > { %2637 = vrcp.f32 %v1810_v16 }
 0x67e   : > { %v2636_v2 = vpop.eup %2635 }
 0x67f   : > { %v1812_v22 = vmul.f32 %v2636_v2, %v2628_v17  ;;  %v1813_v23 = vmul.f32 %v2636_v2, %v2630_v18 }
 0x682   : > { %v2638_v19 = vpop.eup %2637 }
 0x683   : > { %v1815_v24 = vmul.f32 %v2638_v19, %v2632_v56  ;;  %v1816_v25 = vmul.f32 %v2638_v19, %v2634_v21 }
 0x685   : > { %v1817_v26 = vadd.f32 %v1815_v24, %v1812_v22  ;;  %v1824_v27 = vadd.f32 %v1816_v25, %v1813_v23 }
 0x687   : > { %v1818_v28 = vrot.slane %v1817_v26, 4  ;;  %v1825_v29 = vrot.slane %v1824_v27, 4 }
 0x689   : > { %v1819_v31 = vadd.f32 %v1818_v28, %v1817_v26  ;;  %v1826_v32 = vadd.f32 %v1825_v29, %v1824_v27 }
 0x68b   : > { %v1820_v33 = vrot.slane %v1819_v31, 2  ;;  %v1827_v34 = vrot.slane %v1826_v32, 2 }
 0x68d   : > { %v1821_v60 = vadd.f32 %v1820_v33, %v1819_v31  ;;  %v1828_v35 = vadd.f32 %v1827_v34, %v1826_v32 }
 0x68f   : > { %v1822_v36 = vrot.slane %v1821_v60, 1  ;;  %v1829_v37 = vrot.slane %v1828_v35, 1 }
 0x691   : > { %v1823_v38 = vadd.f32 %v1822_v36, %v1821_v60  ;;  %v1830_v39 = vadd.f32 %v1829_v37, %v1828_v35 }
 0x693   : > { %v1832_v40 = vmul.f32 0.0625, %v1823_v38  ;;  %v1833_v41 = vmul.f32 0.0625, %v1830_v39 }
 0x695   : > { %v2220_v42 = vadd.f32 -0.3, %v1832_v40  ;;  %v2221_v43 = vadd.f32 -0.3, %v1833_v41 }
 0x697   : > { %v1836_v44 = vmax.f32 %v2220_v42, 0.0  ;;  %v1837_v45 = vmax.f32 %v2221_v43, 0.0 }
 0x699   : > { %v1839_v46 = vmul.f32 %v1836_v44, %v1836_v44  ;;  %v1840_v47 = vmul.f32 %v1837_v45, %v1837_v45 }
 0x69b   : > { %v1842_v48 = vsel %vm1841_vm9, %v1839_v46, 0.0  ;;  %v1843_v49 = vsel %vm1841_vm9, %v1840_v47, 0.0 }
 0x69c   : > { %v1844_v50 = vadd.f32 %v1843_v49, %v1842_v48 }
 0x69e   : > { %1845 = vadd.xlane.f32.xlu1 %v1844_v50 }
 0x72b   : > { %v1846_v51 = vpop.xlane.xlu1 %1845 }
 0x72c   : > { %v1847_v52 = vrot.slane %v1846_v51, 4 }
 0x72e   : > { %v1848_v55 = vadd.f32 %v1847_v52, %v1846_v51 }
 0x730   : > { %v1849_v57 = vrot.slane %v1848_v55, 2 }
 0x732   : > { %v1850_v59 = vadd.f32 %v1849_v57, %v1848_v55 }
 0x734   : > { %v1851_v61 = vrot.slane %v1850_v59, 1 }
 0x736   : > { %v1852_v63 = vadd.f32 %v1851_v61, %v1850_v59 }
 0x738   : > { %2530 = vpush %v1852_v63 }
 0x769   : > { %s2531_s17 = spop %2530 }
 0x76a   : > { %v1854_v1 = vstv %s2531_s17 }
 0x76b   : > { %v1855_v3 = vadd.f32 %v1854_v1, %v1838_v0 }
 0x76d   : > { %1856 = vst.msk [vmem:[#allocation5] sm:$0x1] %vm1787_vm5, %v1855_v3 }
 0x76e PF: > { %p1857_p1 = scmp.eq.s32.totalorder %s2805_s16, 1  ;;  %p1858_p3 = scmp.eq.s32.totalorder %s2801_s15, 1 }
 0x770   : > { %p1859_p4 = pnand %p1858_p3, %p1857_p1 }
 0x771   : > { %vm1895_vm10 = vcmp.eq.s32.totalorder (!%p1859_p4), %v3695_v53, %v3697_v54  ;;  %v2823_v5 = vmov (!%p1859_p4), 0.0   ;;  %vm1922_vm11 = vcmask (!%p1859_p4), 8192   ;;  %vm1909_vm12 = vcmask (!%p1859_p4), 1024   ;;  %v1937_v42 = vld [vmem:[#allocation4] sm:$0x1] (!%p1859_p4) }
 0x772   : > { %1862 = sbr.rel (%p1859_p4) target bundleno = 2441 (0x989), region = 76  ;;  %v2222_v6 = vsel (!%p1859_p4), %vm1895_vm10, 1.0, %v2823_v5  ;;  %v1939_v44 = vmul.f32 (!%p1859_p4), 6.1035156e-05, %v1937_v42 }
 0x774   : > { %v1863_v4 = vld [vmem:[#allocation7] sm:$0x3] (!%p1859_p4)  ;;  %v1940_v43 = vld [vmem:[#allocation5] sm:$0x1] (!%p1859_p4)  ;;  %v1943_v46 = vmul.f32 (!%p1859_p4), 0.15, %v1939_v44 }
 0x775   : > { %v1864_v30 = vsel (!%p1859_p4), %vm1758_vm8, %v1863_v4, -inf  ;;  %v1898_v7 = vmul.f32 (!%p1859_p4), %v2222_v6, %v1863_v4  ;;  %v1942_v45 = vmul.f32 (!%p1859_p4), 0.001953125, %v1940_v43 }
 0x776   : > { %1865 = vmax.xlane.f32.xlu0 (!%p1859_p4), %v1864_v30  ;;  %v1876_v9 = vrot.slane (!%p1859_p4), %v1864_v30, 4 }
 0x777   : > { %v1899_v8 = vsel (!%p1859_p4), %vm1758_vm8, %v1898_v7, 0.0  ;;  %v1944_v47 = vmul.f32 (!%p1859_p4), 0.1, %v1942_v45 }
 0x778   : > { %1900 = vadd.xlane.f32.xlu1 (!%p1859_p4), %v1899_v8  ;;  %v1877_v10 = vmax.f32 (!%p1859_p4), %v1864_v30, %v1876_v9  ;;  %v1902_v22 = vrot.slane (!%p1859_p4), %v1899_v8, 4 }
 0x779   : > { %v1945_v48 = vadd.f32 %v1944_v47, %v1943_v46 }
 0x77a   : > { %v1878_v11 = vrot.slane %v1877_v10, 2  ;;  %v1903_v25 = vadd.f32 %v1902_v22, %v1899_v8 }
 0x77b   : > { %1947 = vst.msk [vmem:[#allocation12] sm:$0x1] %vm1787_vm5, %v1945_v48 }
 0x77c   : > { %v1879_v12 = vmax.f32 %v1877_v10, %v1878_v11  ;;  %v1904_v26 = vrot.slane %v1903_v25, 2 }
 0x77e   : > { %v1880_v13 = vrot.slane %v1879_v12, 1  ;;  %v1905_v27 = vadd.f32 %v1904_v26, %v1903_v25 }
 0x780   : > { %v1881_v14 = vmax.f32 %v1879_v12, %v1880_v13  ;;  %v1906_v31 = vrot.slane %v1905_v27, 1 }
 0x782   : > { %v1882_v15 = vsub.f32 %v1863_v4, %v1881_v14  ;;  %v1907_v33 = vadd.f32 %v1906_v31, %v1905_v27 }
 0x784   : > { %v1883_v17 = vmul.f32 1.442695, %v1882_v15 }
 0x786   : > { %2639 = vpow2.f32 %v1883_v17 }
 0x790   : > { %v2640_v53 = vpop.eup %2639 }
 0x791   : > { %v1885_v54 = vsel %vm1758_vm8, %v2640_v53, 0.0 }
 0x792   : > { %v1886_v21 = vrot.slane %v1885_v54, 4 }
 0x794   : > { %v1887_v62 = vadd.f32 %v1886_v21, %v1885_v54 }
 0x796   : > { %v1888_v2 = vrot.slane %v1887_v62, 2 }
 0x798   : > { %v1889_v19 = vadd.f32 %v1888_v2, %v1887_v62 }
 0x79a   : > { %v1890_v23 = vrot.slane %v1889_v19, 1 }
 0x79c   : > { %v1891_v24 = vadd.f32 %v1890_v23, %v1889_v19 }
 0x803   : > { %v1866_v18 = vpop.xlane.xlu0 %1865 }
 0x804   : > { %v1867_v56 = vsub.f32 %v1863_v4, %v1866_v18 }
 0x805   : > { %v1901_v38 = vpop.xlane.xlu1 %1900 }
 0x806   : > { %v1868_v20 = vmul.f32 1.442695, %v1867_v56 }
 0x808   : > { %2641 = vpow2.f32 %v1868_v20 }
 0x809   : > { %2643 = vlog2.f32 %v1891_v24 }
 0x812   : > { %v2642_v58 = vpop.eup %2641 }
 0x813   : > { %v1870_v16 = vsel %vm1758_vm8, %v2642_v58, 0.0  ;;  %v2644_v28 = vpop.eup %2643 }
 0x814   : > { %1871 = vadd.xlane.f32.xlu0 %v1870_v16  ;;  %v1893_v29 = vmul.f32 0.6931472, %v2644_v28 }
 0x816   : > { %v1894_v32 = vadd.f32 %v1893_v29, %v1881_v14 }
 0x818   : > { %v1921_v34 = vsub.f32 %v1894_v32, %v1907_v33 }
 0x81a   : > { %v1923_v60 = vsel %vm1922_vm11, %v1921_v34, 0.0 }
 0x81b   : > { %1924 = vadd.xlane.f32.xlu0 %v1923_v60 }
 0x8a1   : > { %v1872_v35 = vpop.xlane.xlu0 %1871 }
 0x8a2   : > { %2645 = vlog2.f32 %v1872_v35 }
 0x8a8   : > { %v1925_v49 = vpop.xlane.xlu0 %1924 }
 0x8a9   : > { %v1926_v50 = vrot.slane %v1925_v49, 4 }
 0x8ab   : > { %v1927_v51 = vadd.f32 %v1926_v50, %v1925_v49 }
 0x8ac   : > { %v2646_v36 = vpop.eup %2645 }
 0x8ad   : > { %v1874_v37 = vmul.f32 0.6931472, %v2646_v36  ;;  %v1928_v52 = vrot.slane %v1927_v51, 2 }
 0x8af   : > { %v1875_v39 = vadd.f32 %v1874_v37, %v1866_v18  ;;  %v1929_v61 = vadd.f32 %v1928_v52, %v1927_v51 }
 0x8b1   : > { %v1908_v40 = vsub.f32 %v1875_v39, %v1901_v38  ;;  %v1930_v1 = vrot.slane %v1929_v61, 1 }
 0x8b3   : > { %v1910_v41 = vsel %vm1909_vm12, %v1908_v40, 0.0  ;;  %v1931_v30 = vadd.f32 %v1930_v1, %v1929_v61 }
 0x8b4   : > { %1911 = vadd.xlane.f32.xlu1 %v1910_v41 }
 0x941   : > { %v1912_v55 = vpop.xlane.xlu1 %1911 }
 0x942   : > { %v1913_v57 = vrot.slane %v1912_v55, 4 }
 0x944   : > { %v1914_v59 = vadd.f32 %v1913_v57, %v1912_v55 }
 0x946   : > { %v1915_v63 = vrot.slane %v1914_v59, 2 }
 0x948   : > { %v1916_v0 = vadd.f32 %v1915_v63, %v1914_v59 }
 0x94a   : > { %v1917_v3 = vrot.slane %v1916_v0, 1 }
 0x94c   : > { %v1918_v4 = vadd.f32 %v1917_v3, %v1916_v0 }
 0x94e   : > { %2532 = vpush %v1918_v4 }
 0x94f   : > { %2534 = vpush %v1931_v30 }
 0x97f   : > { %s2533_s13 = spop %2532 }
 0x980   : > { %v1920_v5 = vstv %s2533_s13  ;;  %s2535_s21 = spop %2534 }
 0x981   : > { %v1933_v6 = vstv %s2535_s21 }
 0x982   : > { %v1934_v7 = vadd.f32 %v1933_v6, %v1920_v5 }
 0x984   : > { %v1936_v8 = vmul.f32 0.25, %v1934_v7 }
 0x986   : > { %1946 = vst.msk [vmem:[#allocation11] sm:$0x1] %vm1787_vm5, %v1936_v8  ;;  %v1948_v9 = vadd.f32 %v1945_v48, %v1936_v8 }
 0x988   : > { %1949 = vst.msk [vmem:[#allocation9] sm:$0x1] %vm1787_vm5, %v1948_v9 }
 0x989 PF: > { %1956 = sbr.rel (!%p2955_p5) target bundleno = 2448 (0x990), region = 80  ;;  %s2225_s26 = sshll.u32 (%p2955_p5), %s2801_s15, 1  ;;  %v1992_v10 = vld [vmem:[%s2982_s18] sm:$0xff] (%p2955_p5)  ;;  %v1994_v11 = vld [vmem:[%s2982_s18 + $0x8] sm:$0xff] (%p2955_p5) }
 0x98a   : > { %s2241_s19 = sshll.u32 (%p2955_p5), %s2805_s16, 3 }
 0x98b   : > { %s1960_s14 = sadd.s32 (%p2955_p5), %s2241_s19, %s2225_s26 }
 0x98c   : > { %s2227_s27 = sshll.u32 (%p2955_p5), %s1960_s14, 2 }
 0x98d   : > { %s1962_s28 = scalar_lea.vmem (%p2955_p5), %s3851_s10, %s2227_s27 }
 0x98e   : > { %1993 = vst [vmem:[%s1962_s28] sm:$0xff] (%p2955_p5), %v1992_v10  ;;  %1995 = vst [vmem:[%s1962_s28 + $0x10] sm:$0xff] (%p2955_p5), %v1994_v11 }
 0x990 PF: > { %s2824_s20 = smov [#allocation9]   ;;  %s2825_s22 = smov [#allocation7]  }
 0x991   : > { %s2017_s25 = sshll.u32 %s2824_s20, 4  ;;  %s2006_s17 = sshll.u32 %s2825_s22, 4  ;;  %s2018_s25 = int_to_ptr.vmem [resolvable:$true] %s2017_s25  ;;  %s2007_s17 = int_to_ptr.vmem [resolvable:$true] %s2006_s17 }
 0x992   : > { %s2647_s13 = scalar_lea.vmem %s2018_s25, 16  ;;  %s2653_s15 = scalar_lea.vmem %s2018_s25, 32 }
 0x993   : > { %p2648_p5 = scmp.ne.s32.totalorder %s2018_s25, %s2647_s13  ;;  %p2654_p8 = scmp.lt.s32.totalorder %s2018_s25, %s2018_s25 }
 0x994   : > { %p2655_p9 = scmp.lt.s32.totalorder %s2653_s15, %s2647_s13 }
 0x995   : > { %p2649_p6 = pnand %p2648_p5, %p2948_p2 }
 0x996   : > { %p2656_p10 = por %p2655_p9, %p2654_p8 }
 0x997   : > { %p2650_p7 = pneg %p2649_p6 }
 0x999   : > { %p2657_p11 = pnand %p2656_p10, %p2650_p7 }
 0x99b   : > { %2660 = shalt.err (!%p2657_p11)
}
 0x99c   : > { %s2661_s21 = scalar_lea.hbm %s3853_s12, 16 }
 0x99d   : > { %p2662_p12 = scmp.ne.s32.totalorder %s3853_s12, %s2661_s21  ;;  %p2667_p1 = scmp.lt.u32.totalorder %s2661_s21, %s3853_s12 }
 0x99f   : > { %p2663_p13 = pnand %p2662_p12, %p2948_p2 }
 0x9a1   : > { %p2664_p0 = pneg %p2663_p13 }
 0x9a3   : > { %p2669_p3 = pnand %p2667_p1, %p2664_p0 }
 0x9a5   : > { %2672 = shalt.err (!%p2669_p3)
}
 0x9a6   : > { %2539 = dma.vmem_to_hbm [thread:$0]  (%p2948_p2), %s2018_s25, 16, %s3853_s12, [#allocation10]  }
 0x9a7   : > { %s2673_s28 = scalar_lea.vmem %s2007_s17, 32  ;;  %p2680_p7 = scmp.lt.s32.totalorder %s2007_s17, %s2007_s17 }
 0x9a8   : > { %p2674_p4 = scmp.ne.s32.totalorder %s2007_s17, %s2673_s28  ;;  %p2681_p8 = scmp.lt.s32.totalorder %s2673_s28, %s2673_s28 }
 0x9aa   : > { %p2675_p5 = pnand %p2674_p4, %p2948_p2  ;;  %p2682_p9 = por %p2681_p8, %p2680_p7 }
 0x9ac   : > { %p2676_p6 = pneg %p2675_p5 }
 0x9ae   : > { %p2683_p10 = pnand %p2682_p9, %p2676_p6 }
 0x9b0   : > { %2686 = shalt.err (!%p2683_p10)
}
 0x9b1   : > { %s2687_s13 = scalar_lea.hbm %s3852_s11, 32 }
 0x9b2   : > { %p2688_p11 = scmp.ne.s32.totalorder %s3852_s11, %s2687_s13  ;;  %p2693_p0 = scmp.lt.u32.totalorder %s2687_s13, %s3852_s11 }
 0x9b4   : > { %p2689_p12 = pnand %p2688_p11, %p2948_p2 }
 0x9b6   : > { %p2690_p13 = pneg %p2689_p12 }
 0x9b8   : > { %p2695_p1 = pnand %p2693_p0, %p2690_p13 }
 0x9ba   : > { %2698 = shalt.err (!%p2695_p1)
}
 0x9bb   : > { %2537 = dma.vmem_to_hbm [thread:$0]  (%p2948_p2), %s2007_s17, 32, %s3852_s11, [#allocation8]  }
 0x9bc   : > { %s2826_s19 = smov [#allocation11]   ;;  %s2827_s27 = smov [#allocation12]  }
 0x9bd   : > { %s2028_s14 = sshll.u32 %s2826_s19, 4  ;;  %s2039_s29 = sshll.u32 %s2827_s27, 4  ;;  %s2029_s14 = int_to_ptr.vmem [resolvable:$true] %s2028_s14  ;;  %s2040_s29 = int_to_ptr.vmem [resolvable:$true] %s2039_s29 }
 0x9be   : > { %s2699_s23 = scalar_lea.vmem %s2029_s14, 16  ;;  %s2705_s28 = scalar_lea.vmem %s2029_s14, 32 }
 0x9bf   : > { %p2700_p3 = scmp.ne.s32.totalorder %s2029_s14, %s2699_s23  ;;  %p2706_p6 = scmp.lt.s32.totalorder %s2029_s14, %s2029_s14 }
 0x9c0   : > { %p2707_p7 = scmp.lt.s32.totalorder %s2705_s28, %s2699_s23 }
 0x9c1   : > { %p2701_p4 = pnand %p2700_p3, %p2948_p2 }
 0x9c2   : > { %p2708_p8 = por %p2707_p7, %p2706_p6 }
 0x9c3   : > { %p2702_p5 = pneg %p2701_p4 }
 0x9c5   : > { %p2709_p9 = pnand %p2708_p8, %p2702_p5 }
 0x9c7   : > { %2712 = shalt.err (!%p2709_p9)
}
 0x9c8   : > { %s3873_s13 = sld [smem:[#allocation23_spill]] }
 0x9ce   : > { %s2713_s17 = scalar_lea.hbm %s3873_s13, 16 }
 0x9cf   : > { %p2714_p10 = scmp.ne.s32.totalorder %s3873_s13, %s2713_s17  ;;  %p2719_p13 = scmp.lt.u32.totalorder %s2713_s17, %s3873_s13 }
 0x9d1   : > { %p2715_p11 = pnand %p2714_p10, %p2948_p2 }
 0x9d3   : > { %p2716_p12 = pneg %p2715_p11 }
 0x9d5   : > { %p2721_p0 = pnand %p2719_p13, %p2716_p12 }
 0x9d7   : > { %2724 = shalt.err (!%p2721_p0)
}
 0x9d8   : > { %2541 = dma.vmem_to_hbm [thread:$0]  (%p2948_p2), %s2029_s14, 16, %s3873_s13, [#allocation10]  }
 0x9d9   : > { %s2725_s19 = scalar_lea.vmem %s2040_s29, 16  ;;  %s2731_s27 = scalar_lea.vmem %s2040_s29, 32 }
 0x9da   : > { %p2726_p1 = scmp.ne.s32.totalorder %s2040_s29, %s2725_s19  ;;  %p2732_p5 = scmp.lt.s32.totalorder %s2040_s29, %s2040_s29 }
 0x9db   : > { %p2733_p6 = scmp.lt.s32.totalorder %s2731_s27, %s2725_s19 }
 0x9dc   : > { %p2727_p3 = pnand %p2726_p1, %p2948_p2 }
 0x9dd   : > { %p2734_p7 = por %p2733_p6, %p2732_p5 }
 0x9de   : > { %p2728_p4 = pneg %p2727_p3 }
 0x9e0   : > { %p2735_p8 = pnand %p2734_p7, %p2728_p4 }
 0x9e2   : > { %2738 = shalt.err (!%p2735_p8)
}
 0x9e3   : > { %s3874_s20 = sld [smem:[#allocation24_spill]] }
 0x9e9   : > { %s2739_s22 = scalar_lea.hbm %s3874_s20, 16 }
 0x9ea   : > { %p2740_p9 = scmp.ne.s32.totalorder %s3874_s20, %s2739_s22  ;;  %p2745_p12 = scmp.lt.u32.totalorder %s2739_s22, %s3874_s20 }
 0x9ec   : > { %p2741_p10 = pnand %p2740_p9, %p2948_p2 }
 0x9ee   : > { %p2742_p11 = pneg %p2741_p10 }
 0x9f0   : > { %p2747_p13 = pnand %p2745_p12, %p2742_p11 }
 0x9f2   : > { %2750 = shalt.err (!%p2747_p13)
}
 0x9f3   : > { %2543 = dma.vmem_to_hbm [thread:$0]  (%p2948_p2), %s2040_s29, 16, %s3874_s20, [#allocation13]  }
 0x9f4   : > { %2780 = dma.done.wait (%p2948_p2), [#allocation8], 32  }
 0x9f5   : > { %2782 = vsyncadd (%p2948_p2), [#allocation8], 4294967264 }
 0x9f6   : > { %2784 = dma.done.wait (%p2948_p2), [#allocation10], 32  }
 0x9f7   : > { %2786 = vsyncadd (%p2948_p2), [#allocation10], 4294967264 }
 0x9f8   : > { %2788 = dma.done.wait (%p2948_p2), [#allocation13], 16  }
 0x9f9   : > { %2790 = vsyncadd (%p2948_p2), [#allocation13], 4294967280 }
 0x9fa PF: > { %s3875_s21 = sld [smem:[#allocation19_spill]]  ;;  %s3876_s26 = sld [smem:[#allocation22_spill]] }
 0x9fb   : > { %s3877_s15 = sld [smem:[#allocation17_spill]]  ;;  %s3878_s16 = sld [smem:[#allocation18_spill]] }
 0x9fc   : > { %s3879_s17 = sld [smem:[#allocation20_spill]]  ;;  %s3880_s18 = sld [smem:[#allocation21_spill]] }
 0x9fd   : > { %s3881_s29 = smov %s2797_s30 }
 0xa00   : > { %s28_s19 = sadd.s32 1, %s3875_s21   ;;  %s3882_s30 = smov %s3876_s26 }
 0xa01   : > { %p25_p0 = scmp.ge.s32.totalorder %s28_s19, 6  }
 0xa03   :  { %27 = sbr.rel (!%p25_p0) target bundleno = 9 (0x9), region = 181 }
 0xa0a   :  { %2071 = vsyncpa [#allocation8], 1 }
 0xa0b   :  { %2073 = vsyncpa [#allocation8 + $0x1], 1 }
 0xa0c   :  { %2074 = vsyncpa [#allocation10], 1 }
 0xa0d   :  { %2075 = vsyncpa [#allocation13], 1 }

</bundles_post_ra>
